<compile_context>
chip_gen: v5e
topology: v5e:2x2
jax: 0.10.0
libtpu: 0.0.40
codegen_flags: <defaults>
</compile_context>

<pallas_src>
import jax
import jax.numpy as jnp
from jax.experimental import pallas as pl
from jax.experimental.pallas import tpu as pltpu


def _dense_decoder_kernel(x_ref, w_ref, b_ref, o_ref):
    # x_ref: (N, C_in)   full block (tiny; re-used by every column block)
    # w_ref: (C_in, TN)  column block of the flattened transposed-conv weight
    # b_ref: (1, TN)     column block of the per-output-pixel bias row
    # o_ref: (N, TN)     lane-dense output block
    x = x_ref[...].astype(w_ref.dtype)       # bf16 MXU path when W is bf16
    acc = jnp.dot(x, w_ref[...], preferred_element_type=jnp.float32)
    o_ref[...] = (acc + b_ref[...]).astype(o_ref.dtype)


def _num_column_blocks(n_flat, c_in, itemsize, *, min_blocks=2,
                       max_block_bytes=8 * 1024 * 1024):
    """Smallest block count >= min_blocks with lane-aligned (mult-of-128) tiles
    whose double-buffered weight tile fits the VMEM budget."""
    if n_flat % 128 != 0:
        return 1                                # only a full-extent block is legal
    max_blocks = n_flat // 128
    for nb in range(max(1, min_blocks), max_blocks + 1):
        if n_flat % nb:
            continue
        tn = n_flat // nb
        if tn % 128:
            continue
        if 2 * c_in * tn * itemsize <= max_block_bytes:   # double-buffered W tile
            return nb
    return max_blocks


def dense_decoder_layer(x_nchw, weight, bias, *,
                        compute_dtype=jnp.bfloat16,
                        min_column_blocks=2,
                        max_block_bytes=8 * 1024 * 1024):
    """ConvTranspose2d(stride=1, pad=0) on a 1x1-spatial input, via Pallas.

    x_nchw : (N, C_in, 1, 1)      float32
    weight : (C_in, C_out, K, K)  float32  (PyTorch ConvTranspose2d layout)
    bias   : (C_out,)             float32
    returns: (N, C_out, K, K)     float32
    """
    N, C_in, H, W = x_nchw.shape
    assert H == 1 and W == 1, "DenseDecoderLayer expects 1x1 spatial input"
    C_in_w, C_out, K, K2 = weight.shape
    assert C_in_w == C_in and K == K2

    n_flat = C_out * K * K

    x2d = x_nchw.reshape(N, C_in)                                    # (N, C_in)
    w2d = weight.reshape(C_in, n_flat).astype(compute_dtype)         # (C_in, n_flat)
    # Bias broadcast to one row per flattened output pixel (column co*K*K + p
    # gets bias[co]); ~C_out*K*K*4 bytes, small vs the weight stream.
    b_row = jnp.broadcast_to(bias[:, None], (C_out, K * K)).reshape(1, n_flat)
    b_row = b_row.astype(jnp.float32)

    nb = _num_column_blocks(n_flat, C_in, jnp.dtype(compute_dtype).itemsize,
                            min_blocks=min_column_blocks,
                            max_block_bytes=max_block_bytes)
    tn = n_flat // nb

    out_flat = pl.pallas_call(
        _dense_decoder_kernel,
        out_shape=jax.ShapeDtypeStruct((N, n_flat), jnp.float32),
        grid=(nb,),
        in_specs=[
            pl.BlockSpec((N, C_in), lambda j: (0, 0)),   # whole X every step (tiny)
            pl.BlockSpec((C_in, tn), lambda j: (0, j)),  # weight column block
            pl.BlockSpec((1, tn), lambda j: (0, j)),     # bias column block
        ],
        out_specs=pl.BlockSpec((N, tn), lambda j: (0, j)),
        compiler_params=pltpu.CompilerParams(
            # Independent column blocks: lets v7x shard them across its 2 TCs;
            # harmless (near-neutral) on single-TC v5e/v6e.
            dimension_semantics=("parallel",),
        ),
    )(x2d, w2d, b_row)

    return out_flat.reshape(N, C_out, K, K)


def _reference(x_nchw, weight, bias, *, compute_dtype=jnp.bfloat16):
    # Pure-JAX reference for ConvTranspose2d(stride=1, pad=0) on 1x1 input,
    # with inputs rounded to the kernel's streaming dtype so tolerances stay tight.
    N, C_in, _, _ = x_nchw.shape
    x2d = x_nchw.reshape(N, C_in).astype(compute_dtype).astype(jnp.float32)
    w_q = weight.astype(compute_dtype).astype(jnp.float32)
    return jnp.einsum("nc,cokl->nokl", x2d, w_q) + bias[None, :, None, None]


if __name__ == "__main__":
    # Module hyper-params (small but consistent with the module's definition).
    scale = 0
    spatial_size = 16                            # kernel_size K
    in_size = 32                                 # in_channels
    out_channels = 64 * min(2 ** scale, 16)      # = 64

    batch = 2

    key = jax.random.PRNGKey(0)
    kx, kw, kb = jax.random.split(key, 3)

    # Deterministic synthetic parameters (PyTorch ConvTranspose2d weight layout:
    # (in_channels, out_channels, kH, kW)).
    fan_in = in_size * spatial_size * spatial_size
    bound = 1.0 / jnp.sqrt(jnp.float32(fan_in))
    weight = jax.random.uniform(
        kw, (in_size, out_channels, spatial_size, spatial_size),
        dtype=jnp.float32, minval=-bound, maxval=bound)
    bias = jax.random.uniform(
        kb, (out_channels,), dtype=jnp.float32, minval=-bound, maxval=bound)

    # Dense latent input: (N, C_in, 1, 1) NCHW.
    x = jax.random.normal(kx, (batch, in_size, 1, 1), dtype=jnp.float32)

    out = dense_decoder_layer(x, weight, bias)
    out = jax.block_until_ready(out)

    ref = _reference(x, weight, bias)
    assert out.shape == (batch, out_channels, spatial_size, spatial_size)
    assert jnp.allclose(out, ref, atol=1e-5, rtol=1e-5), "mismatch vs reference"

    print("KERNEL_OK")
</pallas_src>

<mosaic_0001>
module attributes {stable_mosaic.version = 11 : i64} {
  func.func @_dense_decoder_kernel(%arg0: i32, %arg1: memref<2x32xf32, #tpu.memory_space<vmem>>, %arg2: memref<32x8192xbf16, #tpu.memory_space<vmem>>, %arg3: memref<1x8192xf32, #tpu.memory_space<vmem>>, %arg4: memref<2x8192xf32, #tpu.memory_space<vmem>>) attributes {dimension_semantics = [#tpu.dimension_semantics<parallel>], iteration_bounds = array<i64: 2>, scalar_prefetch = 0 : i64, scratch_operands = 0 : i64, tpu.core_type = #tpu.core_type<tc>, window_params = [{pipeline_mode = #tpu.pipeline_mode<synchronous>, transform_indices = @transform_0, window_bounds = array<i64: 2, 32>}, {transform_indices = @transform_1, window_bounds = array<i64: 32, 8192>}, {transform_indices = @transform_2, window_bounds = array<i64: 1, 8192>}, {transform_indices = @transform_3, window_bounds = array<i64: 2, 8192>}]} {
    %c0 = arith.constant 0 : index
    %c0_0 = arith.constant 0 : index
    %0 = vector.load %arg1[%c0, %c0_0] : memref<2x32xf32, #tpu.memory_space<vmem>>, vector<2x32xf32>
    %1 = arith.truncf %0 : vector<2x32xf32> to vector<2x32xbf16>
    %c0_1 = arith.constant 0 : index
    %c0_2 = arith.constant 0 : index
    %2 = vector.load %arg2[%c0_1, %c0_2] : memref<32x8192xbf16, #tpu.memory_space<vmem>>, vector<32x8192xbf16>
    %cst = arith.constant dense<0.000000e+00> : vector<2x8192xf32>
    %3 = tpu.matmul %1, %2, %cst {dimension_numbers = #tpu.dot_dimension_numbers<[1], [0], [0], [1], [0, 0, 1, 1], [], []>} : vector<2x32xbf16>, vector<32x8192xbf16>, vector<2x8192xf32> -> vector<2x8192xf32>
    %c0_3 = arith.constant 0 : index
    %c0_4 = arith.constant 0 : index
    %4 = vector.load %arg3[%c0_3, %c0_4] : memref<1x8192xf32, #tpu.memory_space<vmem>>, vector<1x8192xf32>
    %5 = vector.broadcast %4 : vector<1x8192xf32> to vector<2x8192xf32>
    %6 = arith.addf %3, %5 : vector<2x8192xf32>
    %c0_5 = arith.constant 0 : index
    %c0_6 = arith.constant 0 : index
    %7 = vector.load %arg4[%c0_5, %c0_6] : memref<2x8192xf32, #tpu.memory_space<vmem>>, vector<2x8192xf32>
    tpu.vector_store %arg4[%c0_5, %c0_6], %6 {strides = array<i32>} : memref<2x8192xf32, #tpu.memory_space<vmem>>, vector<2x8192xf32>,
    return
  }
  func.func @transform_0(%arg0: i32) -> (i32, i32) {
    %c0_i32 = arith.constant 0 : i32
    %c0_i32_0 = arith.constant 0 : i32
    %c0_i32_1 = arith.constant 0 : i32
    return %c0_i32, %c0_i32_0 : i32, i32
  }
  func.func @transform_1(%arg0: i32) -> (i32, i32) {
    %c0_i32 = arith.constant 0 : i32
    %c0_i32_0 = arith.constant 0 : i32
    return %c0_i32, %arg0 : i32, i32
  }
  func.func @transform_2(%arg0: i32) -> (i32, i32) {
    %c0_i32 = arith.constant 0 : i32
    %c0_i32_0 = arith.constant 0 : i32
    return %c0_i32, %arg0 : i32, i32
  }
  func.func @transform_3(%arg0: i32) -> (i32, i32) {
    %c0_i32 = arith.constant 0 : i32
    %c0_i32_0 = arith.constant 0 : i32
    return %c0_i32, %arg0 : i32, i32
  }
}

</mosaic_0001>

<bundles_post_ra>
// kernel: tpu_custom_call.1
= control target key start
LH: loop header
LB: loop body
LE: loop exit
PB: predicated region body
PF: predicated region fallthrough
CT: control target
= control target key end

     0   :  { %s3954_s0 = inlined_call_operand.hbm [shape: f32[2,32], index: 0, kind: input, shape index: {}]   ;;  %s3955_s1 = inlined_call_operand.hbm [shape: bf16[32,16384], index: 1, kind: input, shape index: {}]   ;;  %s3956_s2 = inlined_call_operand.hbm [shape: f32[1,16384], index: 2, kind: input, shape index: {}]   ;;  %s3957_s3 = inlined_call_operand.hbm [shape: f32[2,16384], index: 3, kind: output, shape index: {}]  }
   0x1   :  { %3958 = sst [smem:[#allocation12_spill]] %s3954_s0 }
   0x2   :  { %8 = vsyncpa [#allocation3], 0 }
   0x3   :  { %9 = vsyncpa [#allocation6], 0 }
   0x4   :  { %11 = vsyncpa [#allocation6 + $0x1], 0 }
   0x5   :  { %12 = vsyncpa [#allocation4], 0 }
   0x6   :  { %14 = vsyncpa [#allocation4 + $0x1], 0  ;;  %s3286_s12 = smov 0   ;;  %s3288_s13 = smov 0  }
   0x7   :  { %s3290_s14 = smov 0   ;;  %s3292_s15 = smov 0  }
   0x8 LB: > { %s3307_s16 = sadd.s32 1, %s3260_s15   ;;  %s48_s17 = sadd.s32 1, %s3256_s14  ;;  %s3260_s15 = sphi %s3292_s15, %s3969_s15   ;;  %s3256_s14 = sphi %s3290_s14, %s3968_s14   ;;  %s3252_s13 = sphi %s3288_s13, %s3967_s13   ;;  %s3248_s12 = sphi %s3286_s12, %s3966_s12  }
   0x9   : > { %s45_s18 = ssub.s32 %s3260_s15, %s3307_s16  ;;  %p55_p0 = scmp.ne.s32.totalorder %s3256_s14, %s3252_s13 }
   0xa   : > { %p46_p1 = scmp.eq.s32.totalorder %s45_s18, 0  ;;  %p56_p2 = scmp.eq.s32.totalorder %s3260_s15, 0 }
   0xb   : > { %p3061_p4 = scmp.lt.s32.totalorder %s3260_s15, 2  ;;  %s149_s20 = sand.u32 1, %s3260_s15  }
   0xc   : > { %s3318_s19 = scalar_select %p46_p1, %s3256_s14, %s48_s17  }
   0xd   : > { %p57_p5 = por %p56_p2, %p55_p0  ;;  %s151_s21 = sand.u32 1, %s3256_s14  }
   0xe   : > { %s2314_s22 = sshll.u32 %s151_s21, 10  ;;  %s2905_s23 = sshll.u32 %s3260_s15, 8 }
   0xf   : > { %s158_s26 = scalar_lea.hbm %s3955_s1, %s2905_s23  ;;  %s153_s28 = scalar_lea.vmem [#allocation5], %s2314_s22 }
  0x10   : > { %s159_s27 = sshll.u32 %s158_s26, 4  ;;  %s161_s29 = sshll.u32 %s153_s28, 4  ;;  %s160_s27 = int_to_ptr.hbm [resolvable:$true] %s159_s27  ;;  %s162_s29 = int_to_ptr.vmem [resolvable:$true] %s161_s29 }
  0x11   : > { %p3333_p6 = pnand %p3061_p4, %p57_p5  ;;  %s3337_s4 = scalar_lea.sflag [#allocation6], %s149_s20 }
  0x12   : > { %s3100_s5 = sshra.s32 %s160_s27, 4  ;;  %s3107_s9 = scalar_lea.hbm %s3955_s1, 2048  ;;  %s3101_s5 = int_to_ptr.hbm [resolvable:$true] %s3100_s5 }
  0x13   : > { %s3102_s6 = scalar_lea.hbm %s3101_s5, 1024  ;;  %p3104_p8 = pneg %p3333_p6 }
  0x14   : > { %p3103_p7 = scmp.ne.s32.totalorder %s3101_s5, %s3102_s6  ;;  %p3108_p11 = scmp.lt.s32.totalorder %s3101_s5, %s3955_s1 }
  0x15   : > { %p3109_p12 = scmp.lt.s32.totalorder %s3107_s9, %s3102_s6 }
  0x16   : > { %p3105_p9 = pnand %p3104_p8, %p3103_p7 }
  0x17   : > { %p3110_p13 = por %p3109_p12, %p3108_p11 }
  0x18   : > { %p3106_p10 = pneg %p3105_p9 }
  0x1a   : > { %p3111_p1 = pnand %p3110_p13, %p3106_p10 }
  0x1c   : > { %3114 = shalt.err (!%p3111_p1)
}
  0x1d   : > { %s3262_s17 = smov 8192   ;;  %s3263_s18 = smov 4096  }
  0x1e   : > { %s3264_s20 = smov 256   ;;  %s3354_s22 = sadd.s32 4294967295, %s3260_s15  }
  0x1f   : > { %3052 = dma.hbm_to_vmem [thread:$0]  (!%p3333_p6), %s160_s27, 16384, %s162_s29, %s3337_s4, %s3262_s17, %s3263_s18, %s3264_s20  }
  0x20   : > { %s2310_s23 = sadd.s32 4294967294, %s3260_s15   ;;  %p61_p2 = scmp.ne.s32.totalorder %s3252_s13, %s3248_s12 }
  0x21   : > { %p62_p4 = scmp.eq.s32.totalorder %s3354_s22, 0  ;;  %p111_p5 = scmp.eq.s32.totalorder %s3354_s22, 1 }
  0x22   : > { %p117_p7 = scmp.eq.s32.totalorder %s2310_s23, 1  ;;  %p2311_p9 = scmp.ge.s32.totalorder %s3260_s15, 1 }
  0x23   : > { %p3364_p10 = por %p62_p4, %p61_p2  ;;  %p3371_p11 = por %p111_p5, %p55_p0 }
  0x24   : > { %p3375_p12 = por %p117_p7, %p61_p2  ;;  %p124_p13 = scmp.lt.s32.totalorder %s3260_s15, 3 }
  0x25   : > { %s3963_s0 = sld [smem:[#allocation12_spill]]  ;;  %s2317_s6 = sshll.u32 %s151_s21, 6 }
  0x26   : > { %p3383_p1 = pnand %p2311_p9, %p124_p13  ;;  %s3265_s7 = smov [#allocation2]  }
  0x27   : > { %s138_s8 = sshll.u32 %s3265_s7, 4  ;;  %s2318_s9 = sshll.u32 %s3260_s15, 6  ;;  %s139_s8 = int_to_ptr.vmem [resolvable:$true] %s138_s8 }
  0x28   : > { %p3045_p0 = pneg %p3383_p1  ;;  %s179_s17 = scalar_lea.hbm %s3956_s2, %s2318_s9 }
  0x29   : > { %s175_s18 = scalar_lea.vmem [#allocation7], %s2317_s6  ;;  %s181_s23 = sshll.u32 %s179_s17, 4  ;;  %s182_s23 = int_to_ptr.hbm [resolvable:$true] %s181_s23 }
  0x2a   : > { %p3046_p2 = pnand %p3045_p0, %p62_p4  ;;  %s183_s20 = sshll.u32 %s175_s18, 4  ;;  %s184_s20 = int_to_ptr.vmem [resolvable:$true] %s183_s20 }
  0x2b   : > { %s136_s29 = sshll.u32 %s3963_s0, 4  ;;  %s3160_s21 = sshra.s32 %s182_s23, 4  ;;  %s137_s29 = int_to_ptr.hbm [resolvable:$true] %s136_s29  ;;  %s3161_s21 = int_to_ptr.hbm [resolvable:$true] %s3160_s21 }
  0x2c   : > { %3048 = dma.hbm_to_vmem [thread:$0]  (!%p3046_p2), %s137_s29, 32, %s139_s8, [#allocation3]  }
  0x2d   : > { %s3162_s27 = scalar_lea.hbm %s3161_s21, 64  ;;  %s3167_s0 = scalar_lea.hbm %s3956_s2, 128 }
  0x2e   : > { %p3163_p5 = scmp.ne.s32.totalorder %s3161_s21, %s3162_s27  ;;  %p3168_p13 = scmp.lt.s32.totalorder %s3161_s21, %s3956_s2 }
  0x2f   : > { %p3169_p0 = scmp.lt.s32.totalorder %s3167_s0, %s3162_s27 }
  0x30   : > { %p3165_p7 = pnand %p3163_p5, %p3104_p8 }
  0x31   : > { %p3170_p2 = por %p3169_p0, %p3168_p13 }
  0x32   : > { %p3166_p9 = pneg %p3165_p7 }
  0x34   : > { %p3171_p3 = pnand %p3170_p2, %p3166_p9 }
  0x36   : > { %3174 = shalt.err (!%p3171_p3)
}
  0x37   : > { %3055 = dma.hbm_to_vmem [thread:$0]  (!%p3333_p6), %s182_s23, 1024, %s184_s20, %s3337_s4  }
  0x38   : > { %192 = sbr.rel (%p3383_p1) target bundleno = 461 (0x1cd), region = 32 }
  0x3d   : > { %3235 = dma.done.wait (%p62_p4), [#allocation3], 32  }
  0x3e   : > { %3237 = vsyncadd (%p62_p4), [#allocation3], 4294967264  ;;  %s199_s0 = sand.u32 1, %s3354_s22   ;;  %s3417_s29 = sand.u32 1, %s3252_s13  }
  0x3f   : > { %s2321_s6 = sshll.u32 %s3417_s29, 10  ;;  %s200_s30 = scalar_lea.sflag [#allocation6], %s199_s0 }
  0x40   : > { %s3420_s8 = scalar_lea.vmem [#allocation5], %s2321_s6 }
  0x41   : > { %3239 = dma.done.wait (%p3364_p10), %s200_s30, 17408  }
  0x42   : > { %3241 = vsyncadd (%p3364_p10), %s200_s30, 4294949888  ;;  %vm1160_vm0 = vcmask 261120   ;;  %v2582_v0 = vld [vmem:[%s3420_s8 + $0x200] sm:$0xf]  ;;  %v2970_v2 = vld [vmem:[%s3420_s8 + $0x204] sm:$0xf] }
  0x43   : > { %v3002_v1 = vld [vmem:[%s3420_s8 + $0x2fc] sm:$0xf0]  ;;  %v2584_v4 = vld [vmem:[%s3420_s8 + $0x300] sm:$0xf0]  ;;  %v2590_v5 = vld [vmem:[%s3420_s8 + $0x208] sm:$0xf] }
  0x44   : > { %v2583_v3 = vor.u32 %v3002_v1, %v2582_v0  ;;  %v3003_v6 = vld [vmem:[%s3420_s8 + $0x304] sm:$0xf0]  ;;  %v2587_v7 = vor.u32 %v2970_v2, %v2584_v4  ;;  %v2971_v9 = vld [vmem:[%s3420_s8 + $0x20c] sm:$0xf]  ;;  %v2326_v11 = vld [vmem:[%s3420_s8] sm:$0xf] }
  0x45   : > { %v2591_v8 = vor.u32 %v3003_v6, %v2590_v5  ;;  %v2592_v10 = vld [vmem:[%s3420_s8 + $0x308] sm:$0xf0]  ;;  %v2938_v13 = vld [vmem:[%s3420_s8 + $0xfc] sm:$0xf0]  ;;  %v2906_v14 = vld [vmem:[%s3420_s8 + $0x4] sm:$0xf] }
  0x46   : > { %1170 = vmatpush.bf16.msra.mxu0 %v2583_v3  ;;  %v2595_v12 = vor.u32 %v2971_v9, %v2592_v10  ;;  %v2328_v15 = vld [vmem:[%s3420_s8 + $0x100] sm:$0xf0]  ;;  %1183 = vmatpush.bf16.msra.mxu1 %v2587_v7  ;;  %v2327_v16 = vor.u32 %v2938_v13, %v2326_v11  ;;  %v2334_v18 = vld [vmem:[%s3420_s8 + $0x8] sm:$0xf]  ;;  %v2907_v20 = vld [vmem:[%s3420_s8 + $0xc] sm:$0xf] }
  0x47   : > { %1196 = vmatpush.bf16.msra.mxu2 %v2591_v8  ;;  %v2331_v17 = vor.u32 %v2906_v14, %v2328_v15  ;;  %v2939_v19 = vld [vmem:[%s3420_s8 + $0x104] sm:$0xf0]  ;;  %v2336_v22 = vld [vmem:[%s3420_s8 + $0x108] sm:$0xf0]  ;;  %v246_v23 = vld [vmem:[#allocation2] sm:$0x3] }
  0x48   : > { %1209 = vmatpush.bf16.msra.mxu3 %v2595_v12  ;;  %v2335_v21 = vor.u32 %v2939_v19, %v2334_v18  ;;  %v2606_v24 = vld [vmem:[%s3420_s8 + $0x218] sm:$0xf]  ;;  %v2339_v25 = vor.u32 %v2907_v20, %v2336_v22  ;;  %v3443_v26 = vpack.c.bf16 %v246_v23, %v246_v23  ;;  %v2973_v28 = vld [vmem:[%s3420_s8 + $0x21c] sm:$0xf]  ;;  %v2598_v32 = vld [vmem:[%s3420_s8 + $0x210] sm:$0xf] }
  0x49   : > { %v3005_v27 = vld [vmem:[%s3420_s8 + $0x314] sm:$0xf0]  ;;  %v2608_v29 = vld [vmem:[%s3420_s8 + $0x318] sm:$0xf0]  ;;  %v3004_v33 = vld [vmem:[%s3420_s8 + $0x30c] sm:$0xf0] }
  0x4a   : > { %1171 = vmatpush.bf16.msra.mxu0 %v2327_v16  ;;  %v2607_v30 = vor.u32 %v3005_v27, %v2606_v24  ;;  %v2611_v31 = vor.u32 %v2973_v28, %v2608_v29  ;;  %v2972_v34 = vld [vmem:[%s3420_s8 + $0x214] sm:$0xf]  ;;  %1184 = vmatpush.bf16.msra.mxu1 %v2331_v17  ;;  %v2599_v35 = vor.u32 %v3004_v33, %v2598_v32  ;;  %v2350_v37 = vld [vmem:[%s3420_s8 + $0x18] sm:$0xf]  ;;  %v2909_v41 = vld [vmem:[%s3420_s8 + $0x1c] sm:$0xf] }
  0x4b   : > { %1197 = vmatpush.bf16.msra.mxu2 %v2335_v21  ;;  %v2600_v36 = vld [vmem:[%s3420_s8 + $0x310] sm:$0xf0]  ;;  %v2941_v38 = vld [vmem:[%s3420_s8 + $0x114] sm:$0xf0]  ;;  %v2352_v42 = vld [vmem:[%s3420_s8 + $0x118] sm:$0xf0] }
  0x4c   : > { %1210 = vmatpush.bf16.msra.mxu3 %v2339_v25  ;;  %v2603_v39 = vor.u32 %v2972_v34, %v2600_v36  ;;  %v2351_v40 = vor.u32 %v2941_v38, %v2350_v37  ;;  %v2342_v43 = vld [vmem:[%s3420_s8 + $0x10] sm:$0xf]  ;;  %v2355_v44 = vor.u32 %v2909_v41, %v2352_v42  ;;  %v2908_v46 = vld [vmem:[%s3420_s8 + $0x14] sm:$0xf]  ;;  %v2622_v48 = vld [vmem:[%s3420_s8 + $0x228] sm:$0xf] }
  0x4d   : > { %2836 = vmatmul.msk.bf16.vlgmr.msra.gmra.mxu0 %vm1160_vm0, %v3443_v26  ;;  %v2940_v45 = vld [vmem:[%s3420_s8 + $0x10c] sm:$0xf0]  ;;  %v2344_v47 = vld [vmem:[%s3420_s8 + $0x110] sm:$0xf0]  ;;  %2837 = vmatmul.msk.bf16.vlgmr.msra.gmra.mxu1 %vm1160_vm0, %v3443_v26  ;;  %v3007_v49 = vld [vmem:[%s3420_s8 + $0x324] sm:$0xf0] }
  0x4e   : > { %2838 = vmatmul.msk.bf16.vlgmr.msra.gmra.mxu2 %vm1160_vm0, %v3443_v26  ;;  %v2975_v50 = vld [vmem:[%s3420_s8 + $0x22c] sm:$0xf]  ;;  %1222 = vmatpush.bf16.msrb.mxu0 %v2599_v35  ;;  %v2343_v51 = vor.u32 %v2940_v45, %v2342_v43  ;;  %v2623_v52 = vor.u32 %v3007_v49, %v2622_v48  ;;  %v2614_v54 = vld [vmem:[%s3420_s8 + $0x220] sm:$0xf]  ;;  %v2347_v56 = vor.u32 %v2908_v46, %v2344_v47  ;;  %v2974_v59 = vld [vmem:[%s3420_s8 + $0x224] sm:$0xf] }
  0x4f   : > { %1248 = vmatpush.bf16.msrb.mxu2 %v2607_v30  ;;  %2839 = vmatmul.msk.bf16.vlgmr.msra.gmra.mxu3 %vm1160_vm0, %v3443_v26  ;;  %v2624_v53 = vld [vmem:[%s3420_s8 + $0x328] sm:$0xf0]  ;;  %v3006_v55 = vld [vmem:[%s3420_s8 + $0x31c] sm:$0xf0]  ;;  %v2616_v60 = vld [vmem:[%s3420_s8 + $0x320] sm:$0xf0] }
  0x50   : > { %1261 = vmatpush.bf16.msrb.mxu3 %v2611_v31  ;;  %1235 = vmatpush.bf16.msrb.mxu1 %v2603_v39  ;;  %v2627_v57 = vor.u32 %v2975_v50, %v2624_v53  ;;  %v2615_v58 = vor.u32 %v3006_v55, %v2614_v54  ;;  %v2366_v61 = vld [vmem:[%s3420_s8 + $0x28] sm:$0xf]  ;;  %v2619_v62 = vor.u32 %v2974_v59, %v2616_v60  ;;  %v2911_v0 = vld [vmem:[%s3420_s8 + $0x2c] sm:$0xf]  ;;  %v2358_v4 = vld [vmem:[%s3420_s8 + $0x20] sm:$0xf] }
  0x51   : > { %v2943_v63 = vld [vmem:[%s3420_s8 + $0x124] sm:$0xf0]  ;;  %v2368_v1 = vld [vmem:[%s3420_s8 + $0x128] sm:$0xf0]  ;;  %v2942_v5 = vld [vmem:[%s3420_s8 + $0x11c] sm:$0xf0] }
  0x52   : > { %v2367_v2 = vor.u32 %v2943_v63, %v2366_v61  ;;  %v2371_v3 = vor.u32 %v2911_v0, %v2368_v1  ;;  %v2910_v6 = vld [vmem:[%s3420_s8 + $0x24] sm:$0xf]  ;;  %1223 = vmatpush.bf16.msrb.mxu0 %v2343_v51  ;;  %v2359_v8 = vor.u32 %v2942_v5, %v2358_v4  ;;  %v2638_v10 = vld [vmem:[%s3420_s8 + $0x238] sm:$0xf]  ;;  %v2977_v12 = vld [vmem:[%s3420_s8 + $0x23c] sm:$0xf] }
  0x53   : > { %1249 = vmatpush.bf16.msrb.mxu2 %v2351_v40  ;;  %v2360_v7 = vld [vmem:[%s3420_s8 + $0x120] sm:$0xf0]  ;;  %v3009_v11 = vld [vmem:[%s3420_s8 + $0x334] sm:$0xf0]  ;;  %v2640_v13 = vld [vmem:[%s3420_s8 + $0x338] sm:$0xf0] }
  0x54   : > { %1262 = vmatpush.bf16.msrb.mxu3 %v2355_v44  ;;  %1236 = vmatpush.bf16.msrb.mxu1 %v2347_v56  ;;  %v2363_v9 = vor.u32 %v2910_v6, %v2360_v7  ;;  %v2630_v14 = vld [vmem:[%s3420_s8 + $0x230] sm:$0xf]  ;;  %v2976_v16 = vld [vmem:[%s3420_s8 + $0x234] sm:$0xf]  ;;  %v2639_v18 = vor.u32 %v3009_v11, %v2638_v10  ;;  %v2643_v19 = vor.u32 %v2977_v12, %v2640_v13  ;;  %v2382_v21 = vld [vmem:[%s3420_s8 + $0x38] sm:$0xf] }
  0x55   : > { %v3008_v15 = vld [vmem:[%s3420_s8 + $0x32c] sm:$0xf0]  ;;  %v2632_v17 = vld [vmem:[%s3420_s8 + $0x330] sm:$0xf0]  ;;  %v2945_v22 = vld [vmem:[%s3420_s8 + $0x134] sm:$0xf0] }
  0x56   : > { %1274 = vmatpush.bf16.msra.mxu0 %v2615_v58  ;;  %v2631_v20 = vor.u32 %v3008_v15, %v2630_v14  ;;  %v2913_v23 = vld [vmem:[%s3420_s8 + $0x3c] sm:$0xf]  ;;  %v2635_v24 = vor.u32 %v2976_v16, %v2632_v17  ;;  %v2374_v27 = vld [vmem:[%s3420_s8 + $0x30] sm:$0xf]  ;;  %v2912_v29 = vld [vmem:[%s3420_s8 + $0x34] sm:$0xf]  ;;  %v2383_v31 = vor.u32 %v2945_v22, %v2382_v21 }
  0x57   : > { %1300 = vmatpush.bf16.msra.mxu2 %v2623_v52  ;;  %v2384_v25 = vld [vmem:[%s3420_s8 + $0x138] sm:$0xf0]  ;;  %v2944_v28 = vld [vmem:[%s3420_s8 + $0x12c] sm:$0xf0]  ;;  %v2376_v30 = vld [vmem:[%s3420_s8 + $0x130] sm:$0xf0] }
  0x58   : > { %1313 = vmatpush.bf16.msra.mxu3 %v2627_v57  ;;  %1287 = vmatpush.bf16.msra.mxu1 %v2619_v62  ;;  %v2387_v32 = vor.u32 %v2913_v23, %v2384_v25  ;;  %v2375_v33 = vor.u32 %v2944_v28, %v2374_v27  ;;  %v2379_v34 = vor.u32 %v2912_v29, %v2376_v30  ;;  %v2654_v35 = vld [vmem:[%s3420_s8 + $0x248] sm:$0xf]  ;;  %v2979_v37 = vld [vmem:[%s3420_s8 + $0x24c] sm:$0xf]  ;;  %v2646_v39 = vld [vmem:[%s3420_s8 + $0x240] sm:$0xf] }
  0x59   : > { %v3011_v36 = vld [vmem:[%s3420_s8 + $0x344] sm:$0xf0]  ;;  %v2656_v38 = vld [vmem:[%s3420_s8 + $0x348] sm:$0xf0]  ;;  %v3010_v40 = vld [vmem:[%s3420_s8 + $0x33c] sm:$0xf0] }
  0x5a   : > { %1275 = vmatpush.bf16.msra.mxu0 %v2359_v8  ;;  %v2978_v41 = vld [vmem:[%s3420_s8 + $0x244] sm:$0xf]  ;;  %v2655_v43 = vor.u32 %v3011_v36, %v2654_v35  ;;  %v2659_v44 = vor.u32 %v2979_v37, %v2656_v38  ;;  %v2647_v45 = vor.u32 %v3010_v40, %v2646_v39  ;;  %v2398_v46 = vld [vmem:[%s3420_s8 + $0x48] sm:$0xf]  ;;  %v2915_v48 = vld [vmem:[%s3420_s8 + $0x4c] sm:$0xf] }
  0x5b   : > { %1301 = vmatpush.bf16.msra.mxu2 %v2367_v2  ;;  %v2648_v42 = vld [vmem:[%s3420_s8 + $0x340] sm:$0xf0]  ;;  %v2947_v47 = vld [vmem:[%s3420_s8 + $0x144] sm:$0xf0]  ;;  %v2400_v50 = vld [vmem:[%s3420_s8 + $0x148] sm:$0xf0] }
  0x5c   : > { %1314 = vmatpush.bf16.msra.mxu3 %v2371_v3  ;;  %1288 = vmatpush.bf16.msra.mxu1 %v2363_v9  ;;  %v2651_v49 = vor.u32 %v2978_v41, %v2648_v42  ;;  %v2390_v51 = vld [vmem:[%s3420_s8 + $0x40] sm:$0xf]  ;;  %v2914_v53 = vld [vmem:[%s3420_s8 + $0x44] sm:$0xf]  ;;  %v2399_v55 = vor.u32 %v2947_v47, %v2398_v46  ;;  %v2403_v56 = vor.u32 %v2915_v48, %v2400_v50  ;;  %v2670_v59 = vld [vmem:[%s3420_s8 + $0x258] sm:$0xf] }
  0x5d   : > { %2840 = vmatmul.msk.bf16.vlgmr.msrb.gmra.mxu0 %vm1160_vm0, %v3443_v26  ;;  %2841 = vmatmul.msk.bf16.vlgmr.msrb.gmra.mxu1 %vm1160_vm0, %v3443_v26  ;;  %v2946_v52 = vld [vmem:[%s3420_s8 + $0x13c] sm:$0xf0]  ;;  %v2392_v54 = vld [vmem:[%s3420_s8 + $0x140] sm:$0xf0]  ;;  %v3013_v60 = vld [vmem:[%s3420_s8 + $0x354] sm:$0xf0] }
  0x5e   : > { %2842 = vmatmul.msk.bf16.vlgmr.msrb.gmra.mxu2 %vm1160_vm0, %v3443_v26  ;;  %1326 = vmatpush.bf16.msrb.mxu0 %v2631_v20  ;;  %v2391_v57 = vor.u32 %v2946_v52, %v2390_v51  ;;  %v2395_v58 = vor.u32 %v2914_v53, %v2392_v54  ;;  %v2981_v61 = vld [vmem:[%s3420_s8 + $0x25c] sm:$0xf]  ;;  %v2662_v63 = vld [vmem:[%s3420_s8 + $0x250] sm:$0xf]  ;;  %v2980_v1 = vld [vmem:[%s3420_s8 + $0x254] sm:$0xf]  ;;  %v2671_v3 = vor.u32 %v3013_v60, %v2670_v59 }
  0x5f   : > { %2843 = vmatmul.msk.bf16.vlgmr.msrb.gmra.mxu3 %vm1160_vm0, %v3443_v26  ;;  %1352 = vmatpush.bf16.msrb.mxu2 %v2639_v18  ;;  %v2672_v62 = vld [vmem:[%s3420_s8 + $0x358] sm:$0xf0]  ;;  %v3012_v0 = vld [vmem:[%s3420_s8 + $0x34c] sm:$0xf0]  ;;  %v2664_v2 = vld [vmem:[%s3420_s8 + $0x350] sm:$0xf0] }
  0x60   : > { %1365 = vmatpush.bf16.msrb.mxu3 %v2643_v19  ;;  %1339 = vmatpush.bf16.msrb.mxu1 %v2635_v24  ;;  %v2675_v4 = vor.u32 %v2981_v61, %v2672_v62  ;;  %v2663_v5 = vor.u32 %v3012_v0, %v2662_v63  ;;  %v2414_v6 = vld [vmem:[%s3420_s8 + $0x58] sm:$0xf]  ;;  %v2917_v8 = vld [vmem:[%s3420_s8 + $0x5c] sm:$0xf]  ;;  %v2667_v9 = vor.u32 %v2980_v1, %v2664_v2  ;;  %v2406_v11 = vld [vmem:[%s3420_s8 + $0x50] sm:$0xf] }
  0x61   : > { %v2949_v7 = vld [vmem:[%s3420_s8 + $0x154] sm:$0xf0]  ;;  %v2416_v10 = vld [vmem:[%s3420_s8 + $0x158] sm:$0xf0]  ;;  %v2948_v12 = vld [vmem:[%s3420_s8 + $0x14c] sm:$0xf0] }
  0x62   : > { %1327 = vmatpush.bf16.msrb.mxu0 %v2375_v33  ;;  %v2916_v13 = vld [vmem:[%s3420_s8 + $0x54] sm:$0xf]  ;;  %v2415_v15 = vor.u32 %v2949_v7, %v2414_v6  ;;  %v2419_v16 = vor.u32 %v2917_v8, %v2416_v10  ;;  %v2407_v17 = vor.u32 %v2948_v12, %v2406_v11  ;;  %v2686_v19 = vld [vmem:[%s3420_s8 + $0x268] sm:$0xf]  ;;  %v2983_v21 = vld [vmem:[%s3420_s8 + $0x26c] sm:$0xf] }
  0x63   : > { %1353 = vmatpush.bf16.msrb.mxu2 %v2383_v31  ;;  %v2408_v14 = vld [vmem:[%s3420_s8 + $0x150] sm:$0xf0]  ;;  %v3015_v20 = vld [vmem:[%s3420_s8 + $0x364] sm:$0xf0]  ;;  %v2688_v22 = vld [vmem:[%s3420_s8 + $0x368] sm:$0xf0] }
  0x64   : > { %1366 = vmatpush.bf16.msrb.mxu3 %v2387_v32  ;;  %1340 = vmatpush.bf16.msrb.mxu1 %v2379_v34  ;;  %v2411_v18 = vor.u32 %v2916_v13, %v2408_v14  ;;  %v2678_v23 = vld [vmem:[%s3420_s8 + $0x260] sm:$0xf]  ;;  %v2982_v25 = vld [vmem:[%s3420_s8 + $0x264] sm:$0xf]  ;;  %v2687_v28 = vor.u32 %v3015_v20, %v2686_v19  ;;  %v2691_v29 = vor.u32 %v2983_v21, %v2688_v22  ;;  %v2430_v31 = vld [vmem:[%s3420_s8 + $0x68] sm:$0xf] }
  0x65   : > { %v3014_v24 = vld [vmem:[%s3420_s8 + $0x35c] sm:$0xf0]  ;;  %v2680_v27 = vld [vmem:[%s3420_s8 + $0x360] sm:$0xf0]  ;;  %v2951_v32 = vld [vmem:[%s3420_s8 + $0x164] sm:$0xf0] }
  0x66   : > { %v2679_v30 = vor.u32 %v3014_v24, %v2678_v23  ;;  %v2919_v33 = vld [vmem:[%s3420_s8 + $0x6c] sm:$0xf]  ;;  %v2683_v34 = vor.u32 %v2982_v25, %v2680_v27  ;;  %v2422_v36 = vld [vmem:[%s3420_s8 + $0x60] sm:$0xf]  ;;  %v2918_v38 = vld [vmem:[%s3420_s8 + $0x64] sm:$0xf]  ;;  %v2431_v40 = vor.u32 %v2951_v32, %v2430_v31 }
  0x67   : > { %v2432_v35 = vld [vmem:[%s3420_s8 + $0x168] sm:$0xf0]  ;;  %v2950_v37 = vld [vmem:[%s3420_s8 + $0x15c] sm:$0xf0]  ;;  %v2424_v39 = vld [vmem:[%s3420_s8 + $0x160] sm:$0xf0] }
  0x68   : > { %v2435_v41 = vor.u32 %v2919_v33, %v2432_v35  ;;  %v2423_v42 = vor.u32 %v2950_v37, %v2422_v36  ;;  %v2985_v46 = vld [vmem:[%s3420_s8 + $0x27c] sm:$0xf]  ;;  %v2694_v48 = vld [vmem:[%s3420_s8 + $0x270] sm:$0xf]  ;;  %v2984_v50 = vld [vmem:[%s3420_s8 + $0x274] sm:$0xf] }
  0x69   : > { %v2704_v47 = vld [vmem:[%s3420_s8 + $0x378] sm:$0xf0]  ;;  %v2696_v51 = vld [vmem:[%s3420_s8 + $0x370] sm:$0xf0]  ;;  %v2438_v60 = vld [vmem:[%s3420_s8 + $0x70] sm:$0xf] }
  0x6a   : > { %v2707_v53 = vor.u32 %v2985_v46, %v2704_v47  ;;  %v2448_v59 = vld [vmem:[%s3420_s8 + $0x178] sm:$0xf0]  ;;  %v2952_v61 = vld [vmem:[%s3420_s8 + $0x16c] sm:$0xf0]  ;;  %v2920_v62 = vld [vmem:[%s3420_s8 + $0x74] sm:$0xf] }
  0x6b   : > { %v2440_v63 = vld [vmem:[%s3420_s8 + $0x170] sm:$0xf0]  ;;  %v2439_v2 = vor.u32 %v2952_v61, %v2438_v60  ;;  %v2987_v6 = vld [vmem:[%s3420_s8 + $0x28c] sm:$0xf]  ;;  %v2710_v8 = vld [vmem:[%s3420_s8 + $0x280] sm:$0xf] }
  0x6c   : > { %v2720_v7 = vld [vmem:[%s3420_s8 + $0x388] sm:$0xf0]  ;;  %v2986_v10 = vld [vmem:[%s3420_s8 + $0x284] sm:$0xf]  ;;  %v2454_v20 = vld [vmem:[%s3420_s8 + $0x80] sm:$0xf] }
  0x6d   : > { %2844 = vmatmul.msk.bf16.vlgmr.msra.gmra.mxu0 %vm1160_vm0, %v3443_v26  ;;  %2845 = vmatmul.msk.bf16.vlgmr.msra.gmra.mxu1 %vm1160_vm0, %v3443_v26  ;;  %v2712_v11 = vld [vmem:[%s3420_s8 + $0x380] sm:$0xf0]  ;;  %v2723_v13 = vor.u32 %v2987_v6, %v2720_v7  ;;  %v2464_v19 = vld [vmem:[%s3420_s8 + $0x188] sm:$0xf0]  ;;  %v2954_v21 = vld [vmem:[%s3420_s8 + $0x17c] sm:$0xf0] }
  0x6e   : > { %2846 = vmatmul.msk.bf16.vlgmr.msra.gmra.mxu2 %vm1160_vm0, %v3443_v26  ;;  %1378 = vmatpush.bf16.msra.mxu0 %v2647_v45  ;;  %v3017_v45 = vld [vmem:[%s3420_s8 + $0x374] sm:$0xf0]  ;;  %v2922_v22 = vld [vmem:[%s3420_s8 + $0x84] sm:$0xf]  ;;  %v2455_v27 = vor.u32 %v2954_v21, %v2454_v20  ;;  %v2989_v31 = vld [vmem:[%s3420_s8 + $0x29c] sm:$0xf] }
  0x6f   : > { %2847 = vmatmul.msk.bf16.vlgmr.msra.gmra.mxu3 %vm1160_vm0, %v3443_v26  ;;  %1404 = vmatpush.bf16.msra.mxu2 %v2655_v43  ;;  %v2427_v43 = vor.u32 %v2918_v38, %v2424_v39  ;;  %v2456_v23 = vld [vmem:[%s3420_s8 + $0x180] sm:$0xf0]  ;;  %v2736_v32 = vld [vmem:[%s3420_s8 + $0x398] sm:$0xf0]  ;;  %v2726_v33 = vld [vmem:[%s3420_s8 + $0x290] sm:$0xf] }
  0x70   : > { %1417 = vmatpush.bf16.msra.mxu3 %v2659_v44  ;;  %1391 = vmatpush.bf16.msra.mxu1 %v2651_v49  ;;  %v2702_v44 = vld [vmem:[%s3420_s8 + $0x278] sm:$0xf]  ;;  %v3016_v49 = vld [vmem:[%s3420_s8 + $0x36c] sm:$0xf0]  ;;  %v2988_v35 = vld [vmem:[%s3420_s8 + $0x294] sm:$0xf]  ;;  %v2739_v38 = vor.u32 %v2989_v31, %v2736_v32 }
  0x71   : > { %v2703_v52 = vor.u32 %v3017_v45, %v2702_v44  ;;  %v2695_v54 = vor.u32 %v3016_v49, %v2694_v48  ;;  %v2728_v36 = vld [vmem:[%s3420_s8 + $0x390] sm:$0xf0]  ;;  %v2480_v44 = vld [vmem:[%s3420_s8 + $0x198] sm:$0xf0]  ;;  %v2470_v45 = vld [vmem:[%s3420_s8 + $0x90] sm:$0xf] }
  0x72   : > { %1379 = vmatpush.bf16.msra.mxu0 %v2391_v57  ;;  %v2921_v57 = vld [vmem:[%s3420_s8 + $0x7c] sm:$0xf]  ;;  %v2956_v46 = vld [vmem:[%s3420_s8 + $0x18c] sm:$0xf0]  ;;  %v2924_v47 = vld [vmem:[%s3420_s8 + $0x94] sm:$0xf] }
  0x73   : > { %1405 = vmatpush.bf16.msra.mxu2 %v2399_v55  ;;  %v2446_v55 = vld [vmem:[%s3420_s8 + $0x78] sm:$0xf]  ;;  %v2451_v1 = vor.u32 %v2921_v57, %v2448_v59  ;;  %v2472_v48 = vld [vmem:[%s3420_s8 + $0x190] sm:$0xf0]  ;;  %s2322_s4 = sshll.u32 %s3417_s29, 6  ;;  %s2323_s5 = sshll.u32 %s3417_s29, 7 }
  0x74   : > { %1418 = vmatpush.bf16.msra.mxu3 %v2403_v56  ;;  %1392 = vmatpush.bf16.msra.mxu1 %v2395_v58  ;;  %v2953_v56 = vld [vmem:[%s3420_s8 + $0x174] sm:$0xf0]  ;;  %v2699_v58 = vor.u32 %v2984_v50, %v2696_v51  ;;  %v2471_v51 = vor.u32 %v2956_v46, %v2470_v45  ;;  %s3653_s24 = scalar_lea.vmem [#allocation7], %s2322_s4  ;;  %v2752_v57 = vld [vmem:[%s3420_s8 + $0x3a8] sm:$0xf0]  ;;  %vm2108_vm1 = vcmask 1041408  }
  0x75   : > { %v2447_v0 = vor.u32 %v2953_v56, %v2446_v55  ;;  %v3023_v55 = vld [vmem:[%s3420_s8 + $0x3a4] sm:$0xf0]  ;;  %v2991_v56 = vld [vmem:[%s3420_s8 + $0x2ac] sm:$0xf]  ;;  %v3022_v59 = vld [vmem:[%s3420_s8 + $0x39c] sm:$0xf0] }
  0x76   : > { %v2990_v61 = vld [vmem:[%s3420_s8 + $0x2a4] sm:$0xf]  ;;  %v2927_v6 = vld [vmem:[%s3420_s8 + $0xac] sm:$0xf]  ;;  %vm2110_vm2 = vcmask 1045508   ;;  %vm2112_vm3 = vcmask 1043456  }
  0x77   : > { %s3693_s11 = scalar_lea.vmem [#allocation8], %s2323_s5  ;;  %v2760_v45 = vld [vmem:[%s3420_s8 + $0x3b0] sm:$0xf0]  ;;  %s3034_s17 = sshll.u32 %s3354_s22, 7 }
  0x78   : > { %s2203_s23 = scalar_lea.hbm %s3957_s3, %s3034_s17  ;;  %s2205_s21 = sshll.u32 %s3693_s11, 4  ;;  %s2206_s21 = int_to_ptr.vmem [resolvable:$true] %s2205_s21 }
  0x79   : > { %s2207_s22 = sshll.u32 %s2203_s23, 4  ;;  %s2192_s27 = scalar_lea.sflag [#allocation4], %s3417_s29  ;;  %s2208_s22 = int_to_ptr.hbm [resolvable:$true] %s2207_s22 }
  0x7a   : > { %s3204_s28 = sshra.s32 %s2208_s22, 4  ;;  %s3210_s0 = scalar_lea.hbm %s3957_s3, 256  ;;  %s3205_s28 = int_to_ptr.hbm [resolvable:$true] %s3204_s28 }
  0x7b   : > { %s3206_s7 = scalar_lea.hbm %s3205_s28, 128  ;;  %p3211_p4 = scmp.lt.s32.totalorder %s3205_s28, %s3957_s3 }
  0x7c   : > { %p3207_p3 = scmp.ne.s32.totalorder %s3205_s28, %s3206_s7  ;;  %p3212_p10 = scmp.lt.s32.totalorder %s3210_s0, %s3206_s7 }
  0x7d   : > { %2848 = vmatmul.msk.bf16.vlgmr.msrb.gmra.mxu0 %vm1160_vm0, %v3443_v26  ;;  %2849 = vmatmul.msk.bf16.vlgmr.msrb.gmra.mxu1 %vm1160_vm0, %v3443_v26 }
  0x7e   : > { %2850 = vmatmul.msk.bf16.vlgmr.msrb.gmra.mxu2 %vm1160_vm0, %v3443_v26  ;;  %1430 = vmatpush.bf16.msrb.mxu0 %v2663_v5  ;;  %v3019_v5 = vld [vmem:[%s3420_s8 + $0x384] sm:$0xf0]  ;;  %p3208_p6 = pnand %p3207_p3, %p3371_p11  ;;  %p3213_p1 = por %p3212_p10, %p3211_p4 }
  0x7f   : > { %2851 = vmatmul.msk.bf16.vlgmr.msrb.gmra.mxu3 %vm1160_vm0, %v3443_v26  ;;  %1456 = vmatpush.bf16.msrb.mxu2 %v2671_v3  ;;  %v2443_v3 = vor.u32 %v2920_v62, %v2440_v63  ;;  %v2744_v62 = vld [vmem:[%s3420_s8 + $0x3a0] sm:$0xf0] }
  0x80   : > { %1469 = vmatpush.bf16.msrb.mxu3 %v2675_v4  ;;  %1443 = vmatpush.bf16.msrb.mxu1 %v2667_v9  ;;  %v2718_v4 = vld [vmem:[%s3420_s8 + $0x288] sm:$0xf]  ;;  %v3018_v9 = vld [vmem:[%s3420_s8 + $0x37c] sm:$0xf0]  ;;  %v2747_v7 = vor.u32 %v2990_v61, %v2744_v62  ;;  %v2504_v61 = vld [vmem:[%s3420_s8 + $0x1b0] sm:$0xf0]  ;;  %p3209_p8 = pneg %p3208_p6 }
  0x81   : > { %v2719_v12 = vor.u32 %v3019_v5, %v2718_v4  ;;  %v2711_v14 = vor.u32 %v3018_v9, %v2710_v8  ;;  %v2494_v4 = vld [vmem:[%s3420_s8 + $0xa8] sm:$0xf]  ;;  %v2496_v8 = vld [vmem:[%s3420_s8 + $0x1a8] sm:$0xf0]  ;;  %v2486_v9 = vld [vmem:[%s3420_s8 + $0xa0] sm:$0xf] }
  0x82   : > { %1431 = vmatpush.bf16.msrb.mxu0 %v2407_v17  ;;  %v2923_v17 = vld [vmem:[%s3420_s8 + $0x8c] sm:$0xf]  ;;  %v2959_v5 = vld [vmem:[%s3420_s8 + $0x1a4] sm:$0xf0]  ;;  %p3214_p5 = pnand %p3213_p1, %p3209_p8 }
  0x83   : > { %1457 = vmatpush.bf16.msrb.mxu2 %v2415_v15  ;;  %v2462_v15 = vld [vmem:[%s3420_s8 + $0x88] sm:$0xf]  ;;  %v2467_v25 = vor.u32 %v2923_v17, %v2464_v19  ;;  %v2495_v17 = vor.u32 %v2959_v5, %v2494_v4 }
  0x84   : > { %1470 = vmatpush.bf16.msrb.mxu3 %v2419_v16  ;;  %1444 = vmatpush.bf16.msrb.mxu1 %v2411_v18  ;;  %v2955_v16 = vld [vmem:[%s3420_s8 + $0x184] sm:$0xf0]  ;;  %v2715_v18 = vor.u32 %v2986_v10, %v2712_v11  ;;  %v2958_v10 = vld [vmem:[%s3420_s8 + $0x19c] sm:$0xf0] }
  0x85   : > { %v2463_v24 = vor.u32 %v2955_v16, %v2462_v15  ;;  %v2487_v19 = vor.u32 %v2958_v10, %v2486_v9 }
  0x8d   : > { %2852 = vmatmul.msk.bf16.vlgmr.msra.gmra.mxu0 %vm1160_vm0, %v3443_v26  ;;  %2853 = vmatmul.msk.bf16.vlgmr.msra.gmra.mxu1 %vm1160_vm0, %v3443_v26 }
  0x8e   : > { %2854 = vmatmul.msk.bf16.vlgmr.msra.gmra.mxu2 %vm1160_vm0, %v3443_v26  ;;  %1482 = vmatpush.bf16.msra.mxu0 %v2679_v30  ;;  %v3021_v30 = vld [vmem:[%s3420_s8 + $0x394] sm:$0xf0] }
  0x8f   : > { %2855 = vmatmul.msk.bf16.vlgmr.msra.gmra.mxu3 %vm1160_vm0, %v3443_v26  ;;  %1508 = vmatpush.bf16.msra.mxu2 %v2687_v28  ;;  %v2459_v28 = vor.u32 %v2922_v22, %v2456_v23 }
  0x90   : > { %1521 = vmatpush.bf16.msra.mxu3 %v2691_v29  ;;  %1495 = vmatpush.bf16.msra.mxu1 %v2683_v34  ;;  %v2734_v29 = vld [vmem:[%s3420_s8 + $0x298] sm:$0xf]  ;;  %v3020_v34 = vld [vmem:[%s3420_s8 + $0x38c] sm:$0xf0] }
  0x91   : > { %v2735_v37 = vor.u32 %v3021_v30, %v2734_v29  ;;  %v2727_v39 = vor.u32 %v3020_v34, %v2726_v33 }
  0x92   : > { %1483 = vmatpush.bf16.msra.mxu0 %v2423_v42  ;;  %v2925_v42 = vld [vmem:[%s3420_s8 + $0x9c] sm:$0xf] }
  0x93   : > { %1509 = vmatpush.bf16.msra.mxu2 %v2431_v40  ;;  %v2478_v40 = vld [vmem:[%s3420_s8 + $0x98] sm:$0xf]  ;;  %v2483_v50 = vor.u32 %v2925_v42, %v2480_v44  ;;  %v2992_v44 = vld [vmem:[%s3420_s8 + $0x2b4] sm:$0xf] }
  0x94   : > { %1522 = vmatpush.bf16.msra.mxu3 %v2435_v41  ;;  %1496 = vmatpush.bf16.msra.mxu1 %v2427_v43  ;;  %v2957_v41 = vld [vmem:[%s3420_s8 + $0x194] sm:$0xf0]  ;;  %v2731_v43 = vor.u32 %v2988_v35, %v2728_v36 }
  0x95   : > { %v2479_v49 = vor.u32 %v2957_v41, %v2478_v40  ;;  %v2766_v35 = vld [vmem:[%s3420_s8 + $0x2b8] sm:$0xf]  ;;  %v2758_v40 = vld [vmem:[%s3420_s8 + $0x2b0] sm:$0xf] }
  0x96   : > { %v3025_v36 = vld [vmem:[%s3420_s8 + $0x3b4] sm:$0xf0]  ;;  %v3024_v41 = vld [vmem:[%s3420_s8 + $0x3ac] sm:$0xf0] }
  0x9d   : > { %2856 = vmatmul.msk.bf16.vlgmr.msrb.gmra.mxu0 %vm1160_vm0, %v3443_v26  ;;  %2857 = vmatmul.msk.bf16.vlgmr.msrb.gmra.mxu1 %vm1160_vm0, %v3443_v26 }
  0x9e   : > { %2858 = vmatmul.msk.bf16.vlgmr.msrb.gmra.mxu2 %vm1160_vm0, %v3443_v26  ;;  %1534 = vmatpush.bf16.msrb.mxu0 %v2695_v54  ;;  %v2750_v54 = vld [vmem:[%s3420_s8 + $0x2a8] sm:$0xf] }
  0x9f   : > { %2859 = vmatmul.msk.bf16.vlgmr.msrb.gmra.mxu3 %vm1160_vm0, %v3443_v26  ;;  %1560 = vmatpush.bf16.msrb.mxu2 %v2703_v52  ;;  %v2475_v52 = vor.u32 %v2924_v47, %v2472_v48  ;;  %v2767_v48 = vor.u32 %v3025_v36, %v2766_v35  ;;  %v2526_v35 = vld [vmem:[%s3420_s8 + $0xc8] sm:$0xf] }
  0xa0   : > { %1573 = vmatpush.bf16.msrb.mxu3 %v2707_v53  ;;  %1547 = vmatpush.bf16.msrb.mxu1 %v2699_v58  ;;  %v3656_v53 = vld [vmem:[%s3653_s24] sm:$0xff]  ;;  %v2963_v36 = vld [vmem:[%s3420_s8 + $0x1c4] sm:$0xf0] }
  0xa1   : > { %v2742_v58 = vld [vmem:[%s3420_s8 + $0x2a0] sm:$0xf]  ;;  %v393_v63 = vperm.slane %v3656_v53, 1  ;;  %v394_v11 = vperm.slane %v3656_v53, 2  ;;  %v395_v16 = vperm.slane %v3656_v53, 3  ;;  %v397_v46 = vperm.slane %v3656_v53, 5 }
  0xa2   : > { %1535 = vmatpush.bf16.msrb.mxu0 %v2439_v2  ;;  %v2755_v2 = vor.u32 %v2991_v56, %v2752_v57  ;;  %v2512_v56 = vld [vmem:[%s3420_s8 + $0x1b8] sm:$0xf0]  ;;  %v2502_v57 = vld [vmem:[%s3420_s8 + $0xb0] sm:$0xf]  ;;  %v396_v62 = vperm.slane %v3656_v53, 4 }
  0xa3   : > { %1561 = vmatpush.bf16.msrb.mxu2 %v2447_v0 }
  0xa4   : > { %1574 = vmatpush.bf16.msrb.mxu3 %v2451_v1  ;;  %1548 = vmatpush.bf16.msrb.mxu1 %v2443_v3  ;;  %v2751_v1 = vor.u32 %v3023_v55, %v2750_v54  ;;  %v2743_v3 = vor.u32 %v3022_v59, %v2742_v58  ;;  %v2929_v54 = vld [vmem:[%s3420_s8 + $0xbc] sm:$0xf]  ;;  %v2763_v55 = vor.u32 %v2992_v44, %v2760_v45  ;;  %v2960_v58 = vld [vmem:[%s3420_s8 + $0x1ac] sm:$0xf0]  ;;  %v398_v59 = vperm.slane %v3656_v53, 6 }
  0xa5   : > { %v2520_v44 = vld [vmem:[%s3420_s8 + $0x1c0] sm:$0xf0] }
  0xad   : > { %2860 = vmatmul.msk.bf16.vlgmr.msra.gmra.mxu0 %vm1160_vm0, %v3443_v26  ;;  %2861 = vmatmul.msk.bf16.vlgmr.msra.gmra.mxu1 %vm1160_vm0, %v3443_v26 }
  0xae   : > { %2862 = vmatmul.msk.bf16.vlgmr.msra.gmra.mxu2 %vm1160_vm0, %v3443_v26  ;;  %1586 = vmatpush.bf16.msra.mxu0 %v2711_v14  ;;  %v392_v14 = vperm.slane %v3656_v53, 0 }
  0xaf   : > { %2863 = vmatmul.msk.bf16.vlgmr.msra.gmra.mxu3 %vm1160_vm0, %v3443_v26  ;;  %1612 = vmatpush.bf16.msra.mxu2 %v2719_v12  ;;  %v2926_v12 = vld [vmem:[%s3420_s8 + $0xa4] sm:$0xf] }
  0xb0   : > { %1625 = vmatpush.bf16.msra.mxu3 %v2723_v13  ;;  %1599 = vmatpush.bf16.msra.mxu1 %v2715_v18  ;;  %v2488_v13 = vld [vmem:[%s3420_s8 + $0x1a0] sm:$0xf0]  ;;  %v2499_v18 = vor.u32 %v2927_v6, %v2496_v8 }
  0xb1   : > { %v2491_v21 = vor.u32 %v2926_v12, %v2488_v13 }
  0xb2   : > { %1587 = vmatpush.bf16.msra.mxu0 %v2455_v27 }
  0xb3   : > { %1613 = vmatpush.bf16.msra.mxu2 %v2463_v24 }
  0xb4   : > { %1626 = vmatpush.bf16.msra.mxu3 %v2467_v25  ;;  %1600 = vmatpush.bf16.msra.mxu1 %v2459_v28 }
  0xbd   : > { %2864 = vmatmul.msk.bf16.vlgmr.msrb.gmra.mxu0 %vm1160_vm0, %v3443_v26  ;;  %2865 = vmatmul.msk.bf16.vlgmr.msrb.gmra.mxu1 %vm1160_vm0, %v3443_v26 }
  0xbe   : > { %2866 = vmatmul.msk.bf16.vlgmr.msrb.gmra.mxu2 %vm1160_vm0, %v3443_v26  ;;  %1638 = vmatpush.bf16.msrb.mxu0 %v2727_v39  ;;  %v2768_v39 = vld [vmem:[%s3420_s8 + $0x3b8] sm:$0xf0] }
  0xbf   : > { %2867 = vmatmul.msk.bf16.vlgmr.msrb.gmra.mxu3 %vm1160_vm0, %v3443_v26  ;;  %1664 = vmatpush.bf16.msrb.mxu2 %v2735_v37  ;;  %v2993_v37 = vld [vmem:[%s3420_s8 + $0x2bc] sm:$0xf] }
  0xc0   : > { %1677 = vmatpush.bf16.msrb.mxu3 %v2739_v38  ;;  %1651 = vmatpush.bf16.msrb.mxu1 %v2731_v43 }
  0xc2   : > { %1639 = vmatpush.bf16.msrb.mxu0 %v2471_v51  ;;  %v2510_v51 = vld [vmem:[%s3420_s8 + $0xb8] sm:$0xf] }
  0xc3   : > { %1665 = vmatpush.bf16.msrb.mxu2 %v2479_v49  ;;  %v2771_v49 = vor.u32 %v2993_v37, %v2768_v39  ;;  %v2931_v37 = vld [vmem:[%s3420_s8 + $0xcc] sm:$0xf] }
  0xc4   : > { %1678 = vmatpush.bf16.msrb.mxu3 %v2483_v50  ;;  %1652 = vmatpush.bf16.msrb.mxu1 %v2475_v52  ;;  %v2759_v50 = vor.u32 %v3024_v41, %v2758_v40  ;;  %v2961_v52 = vld [vmem:[%s3420_s8 + $0x1b4] sm:$0xf0]  ;;  %v2528_v39 = vld [vmem:[%s3420_s8 + $0x1c8] sm:$0xf0]  ;;  %v2518_v40 = vld [vmem:[%s3420_s8 + $0xc0] sm:$0xf] }
  0xc5   : > { %v2962_v41 = vld [vmem:[%s3420_s8 + $0x1bc] sm:$0xf0] }
  0xca   : > { %v1173_v60 = vpop.f32.mrf.mxu0  ;;  %v1186_v0 = vpop.f32.mrf.mxu1 }
  0xcb   : > { %v1187_v15 = vadd.f32 %v1186_v0, %v393_v63  ;;  %v1174_v25 = vadd.f32 %v1173_v60, %v392_v14  ;;  %v2928_v60 = vld [vmem:[%s3420_s8 + $0xb4] sm:$0xf]  ;;  %v399_v0 = vperm.slane %v3656_v53, 7 }
  0xcc   : > { %v2507_v5 = vor.u32 %v2928_v60, %v2504_v61 }
  0xcd   : > { %2868 = vmatmul.msk.bf16.vlgmr.msra.gmra.mxu0 %vm1160_vm0, %v3443_v26  ;;  %2869 = vmatmul.msk.bf16.vlgmr.msra.gmra.mxu1 %vm1160_vm0, %v3443_v26  ;;  %v2060_v27 = vrot.slane %v1187_v15, 6 }
  0xce   : > { %2870 = vmatmul.msk.bf16.vlgmr.msra.gmra.mxu2 %vm1160_vm0, %v3443_v26  ;;  %1690 = vmatpush.bf16.msra.mxu0 %v2743_v3  ;;  %v2503_v3 = vor.u32 %v2960_v58, %v2502_v57 }
  0xcf   : > { %2871 = vmatmul.msk.bf16.vlgmr.msra.gmra.mxu3 %vm1160_vm0, %v3443_v26  ;;  %1716 = vmatpush.bf16.msra.mxu2 %v2751_v1  ;;  %v2109_v32 = vsel %vm2108_vm1, %v1174_v25, %v2060_v27  ;;  %v2511_v1 = vor.u32 %v2961_v52, %v2510_v51 }
  0xd0   : > { %1729 = vmatpush.bf16.msra.mxu3 %v2755_v2  ;;  %1703 = vmatpush.bf16.msra.mxu1 %v2747_v7  ;;  %v2515_v2 = vor.u32 %v2929_v54, %v2512_v56 }
  0xd1   : > { %v1199_v20 = vpop.f32.mrf.mxu2 }
  0xd2   : > { %v1200_v22 = vadd.f32 %v1199_v20, %v394_v11  ;;  %v1212_v23 = vpop.f32.mrf.mxu3  ;;  %v1175_v24 = vpop.f32.mrf.mxu0  ;;  %1691 = vmatpush.bf16.msra.mxu0 %v2487_v19  ;;  %v3027_v19 = vld [vmem:[%s3420_s8 + $0x3c4] sm:$0xf0]  ;;  %v2995_v20 = vld [vmem:[%s3420_s8 + $0x2cc] sm:$0xf] }
  0xd3   : > { %v1213_v28 = vadd.f32 %v1212_v23, %v395_v16  ;;  %v1188_v29 = vpop.f32.mrf.mxu1  ;;  %1717 = vmatpush.bf16.msra.mxu2 %v2495_v17  ;;  %v3724_v16 = vld [vmem:[%s3653_s24 + $0x8] sm:$0xff]  ;;  %v2774_v23 = vld [vmem:[%s3420_s8 + $0x2c0] sm:$0xf] }
  0xd4   : > { %v2061_v30 = vrot.slane %v1200_v22, 4  ;;  %1730 = vmatpush.bf16.msra.mxu3 %v2499_v18  ;;  %1704 = vmatpush.bf16.msra.mxu1 %v2491_v21  ;;  %v2782_v17 = vld [vmem:[%s3420_s8 + $0x2c8] sm:$0xf]  ;;  %v2784_v21 = vld [vmem:[%s3420_s8 + $0x3c8] sm:$0xf0]  ;;  %v400_v45 = vperm.slane %v3724_v16, 0 }
  0xd5   : > { %v2062_v31 = vrot.slane %v1213_v28, 2  ;;  %v3026_v24 = vld [vmem:[%s3420_s8 + $0x3bc] sm:$0xf0]  ;;  %v2994_v28 = vld [vmem:[%s3420_s8 + $0x2c4] sm:$0xf] }
  0xd6   : > { %v2776_v29 = vld [vmem:[%s3420_s8 + $0x3c0] sm:$0xf0] }
  0xd7   : > { %v2111_v33 = vsel %vm2110_vm2, %v2061_v30, %v2062_v31  ;;  %v401_v30 = vperm.slane %v3724_v16, 1 }
  0xd8   : > { %v2113_v34 = vsel %vm2112_vm3, %v2109_v32, %v2111_v33  ;;  %v2783_v32 = vor.u32 %v3027_v19, %v2782_v17  ;;  %v2787_v33 = vor.u32 %v2995_v20, %v2784_v21  ;;  %v2965_v19 = vld [vmem:[%s3420_s8 + $0x1d4] sm:$0xf0]  ;;  %v2933_v20 = vld [vmem:[%s3420_s8 + $0xdc] sm:$0xf] }
  0xd9   : > { %2175 = vst [vmem:[%s3693_s11] sm:$0xff] %v2113_v34  ;;  %v1201_v38 = vpop.f32.mrf.mxu2  ;;  %v2775_v34 = vor.u32 %v3026_v24, %v2774_v23  ;;  %v2534_v23 = vld [vmem:[%s3420_s8 + $0xd0] sm:$0xf] }
  0xda   : > { %v1214_v42 = vpop.f32.mrf.mxu3  ;;  %v1225_v43 = vpop.f32.mrf.mxu0  ;;  %v2779_v38 = vor.u32 %v2994_v28, %v2776_v29  ;;  %v2964_v24 = vld [vmem:[%s3420_s8 + $0x1cc] sm:$0xf0]  ;;  %v2536_v28 = vld [vmem:[%s3420_s8 + $0x1d0] sm:$0xf0]  ;;  %v404_v29 = vperm.slane %v3724_v16, 4 }
  0xdb   : > { %v1238_v47 = vpop.f32.mrf.mxu1  ;;  %v1226_v9 = vadd.f32 %v1225_v43, %v396_v62  ;;  %v402_v42 = vperm.slane %v3724_v16, 2  ;;  %v2930_v43 = vld [vmem:[%s3420_s8 + $0xc4] sm:$0xf] }
  0xdc   : > { %v1239_v63 = vadd.f32 %v1238_v47, %v397_v46  ;;  %v403_v47 = vperm.slane %v3724_v16, 3  ;;  %v2523_v52 = vor.u32 %v2930_v43, %v2520_v44 }
  0xdd   : > { %2872 = vmatmul.msk.bf16.vlgmr.msrb.gmra.mxu0 %vm1160_vm0, %v3443_v26  ;;  %2873 = vmatmul.msk.bf16.vlgmr.msrb.gmra.mxu1 %vm1160_vm0, %v3443_v26 }
  0xde   : > { %2874 = vmatmul.msk.bf16.vlgmr.msrb.gmra.mxu2 %vm1160_vm0, %v3443_v26  ;;  %1742 = vmatpush.bf16.msrb.mxu0 %v2759_v50  ;;  %v2063_v10 = vrot.slane %v1239_v63, 6  ;;  %v2519_v50 = vor.u32 %v2962_v41, %v2518_v40 }
  0xdf   : > { %2875 = vmatmul.msk.bf16.vlgmr.msrb.gmra.mxu3 %vm1160_vm0, %v3443_v26  ;;  %1768 = vmatpush.bf16.msrb.mxu2 %v2767_v48  ;;  %v2527_v48 = vor.u32 %v2963_v36, %v2526_v35 }
  0xe0   : > { %1781 = vmatpush.bf16.msrb.mxu3 %v2771_v49  ;;  %1755 = vmatpush.bf16.msrb.mxu1 %v2763_v55  ;;  %v2114_v14 = vsel %vm2108_vm1, %v1226_v9, %v2063_v10  ;;  %v2531_v49 = vor.u32 %v2931_v37, %v2528_v39 }
  0xe1   : > { %v1251_v4 = vpop.f32.mrf.mxu2 }
  0xe2   : > { %v1252_v6 = vadd.f32 %v1251_v4, %v398_v59  ;;  %v1264_v7 = vpop.f32.mrf.mxu3  ;;  %v1227_v8 = vpop.f32.mrf.mxu0  ;;  %1743 = vmatpush.bf16.msrb.mxu0 %v2503_v3  ;;  %v3029_v3 = vld [vmem:[%s3420_s8 + $0x3d4] sm:$0xf0]  ;;  %v2997_v4 = vld [vmem:[%s3420_s8 + $0x2dc] sm:$0xf] }
  0xe3   : > { %v1265_v53 = vadd.f32 %v1264_v7, %v399_v0  ;;  %v1240_v11 = vpop.f32.mrf.mxu1  ;;  %1769 = vmatpush.bf16.msrb.mxu2 %v2511_v1  ;;  %v2798_v1 = vld [vmem:[%s3420_s8 + $0x2d8] sm:$0xf]  ;;  %v2790_v7 = vld [vmem:[%s3420_s8 + $0x2d0] sm:$0xf] }
  0xe4   : > { %v2064_v12 = vrot.slane %v1252_v6, 4  ;;  %1782 = vmatpush.bf16.msrb.mxu3 %v2515_v2  ;;  %1756 = vmatpush.bf16.msrb.mxu1 %v2507_v5  ;;  %v2800_v5 = vld [vmem:[%s3420_s8 + $0x3d8] sm:$0xf0]  ;;  %v3028_v8 = vld [vmem:[%s3420_s8 + $0x3cc] sm:$0xf0] }
  0xe5   : > { %v2065_v13 = vrot.slane %v1265_v53, 2  ;;  %v2996_v53 = vld [vmem:[%s3420_s8 + $0x2d4] sm:$0xf]  ;;  %v2791_v17 = vor.u32 %v3028_v8, %v2790_v7  ;;  %v2550_v7 = vld [vmem:[%s3420_s8 + $0xe0] sm:$0xf] }
  0xe6   : > { %v2792_v11 = vld [vmem:[%s3420_s8 + $0x3d0] sm:$0xf0]  ;;  %v2966_v8 = vld [vmem:[%s3420_s8 + $0x1dc] sm:$0xf0] }
  0xe7   : > { %v2115_v15 = vsel %vm2110_vm2, %v2064_v12, %v2065_v13  ;;  %v405_v12 = vperm.slane %v3724_v16, 5  ;;  %v2795_v21 = vor.u32 %v2996_v53, %v2792_v11  ;;  %v2552_v53 = vld [vmem:[%s3420_s8 + $0x1e0] sm:$0xf0] }
  0xe8   : > { %v2116_v18 = vsel %vm2112_vm3, %v2114_v14, %v2115_v15  ;;  %v2799_v14 = vor.u32 %v3029_v3, %v2798_v1  ;;  %v2803_v15 = vor.u32 %v2997_v4, %v2800_v5  ;;  %v2967_v3 = vld [vmem:[%s3420_s8 + $0x1e4] sm:$0xf0]  ;;  %v2935_v4 = vld [vmem:[%s3420_s8 + $0xec] sm:$0xf] }
  0xe9   : > { %2176 = vst [vmem:[%s3693_s11 + $0x8] sm:$0xff] %v2116_v18  ;;  %v1253_v22 = vpop.f32.mrf.mxu2  ;;  %v2542_v18 = vld [vmem:[%s3420_s8 + $0xd8] sm:$0xf] }
  0xea   : > { %v1266_v25 = vpop.f32.mrf.mxu3  ;;  %v1277_v27 = vpop.f32.mrf.mxu0  ;;  %v2544_v22 = vld [vmem:[%s3420_s8 + $0x1d8] sm:$0xf0] }
  0xeb   : > { %v1290_v31 = vpop.f32.mrf.mxu1  ;;  %v1278_v57 = vadd.f32 %v1277_v27, %v400_v45  ;;  %v406_v25 = vperm.slane %v3724_v16, 6  ;;  %v2932_v27 = vld [vmem:[%s3420_s8 + $0xd4] sm:$0xf] }
  0xec   : > { %v1291_v46 = vadd.f32 %v1290_v31, %v401_v30  ;;  %v407_v31 = vperm.slane %v3724_v16, 7  ;;  %v2539_v36 = vor.u32 %v2932_v27, %v2536_v28 }
  0xed   : > { %2876 = vmatmul.msk.bf16.vlgmr.msra.gmra.mxu0 %vm1160_vm0, %v3443_v26  ;;  %2877 = vmatmul.msk.bf16.vlgmr.msra.gmra.mxu1 %vm1160_vm0, %v3443_v26 }
  0xee   : > { %2878 = vmatmul.msk.bf16.vlgmr.msra.gmra.mxu2 %vm1160_vm0, %v3443_v26  ;;  %1794 = vmatpush.bf16.msra.mxu0 %v2775_v34  ;;  %v2066_v58 = vrot.slane %v1291_v46, 6  ;;  %v2535_v34 = vor.u32 %v2964_v24, %v2534_v23 }
  0xef   : > { %2879 = vmatmul.msk.bf16.vlgmr.msra.gmra.mxu3 %vm1160_vm0, %v3443_v26  ;;  %1820 = vmatpush.bf16.msra.mxu2 %v2783_v32  ;;  %v2543_v32 = vor.u32 %v2965_v19, %v2542_v18 }
  0xf0   : > { %1833 = vmatpush.bf16.msra.mxu3 %v2787_v33  ;;  %1807 = vmatpush.bf16.msra.mxu1 %v2779_v38  ;;  %v2117_v63 = vsel %vm2108_vm1, %v1278_v57, %v2066_v58  ;;  %v2547_v33 = vor.u32 %v2933_v20, %v2544_v22 }
  0xf1   : > { %v1303_v51 = vpop.f32.mrf.mxu2 }
  0xf2   : > { %v1304_v54 = vadd.f32 %v1303_v51, %v402_v42  ;;  %v1316_v55 = vpop.f32.mrf.mxu3  ;;  %v1279_v56 = vpop.f32.mrf.mxu0  ;;  %1795 = vmatpush.bf16.msra.mxu0 %v2519_v50  ;;  %v3031_v50 = vld [vmem:[%s3420_s8 + $0x3e4] sm:$0xf0]  ;;  %v2999_v51 = vld [vmem:[%s3420_s8 + $0x2ec] sm:$0xf] }
  0xf3   : > { %v1317_v59 = vadd.f32 %v1316_v55, %v403_v47  ;;  %v1292_v60 = vpop.f32.mrf.mxu1  ;;  %1821 = vmatpush.bf16.msra.mxu2 %v2527_v48  ;;  %v3791_v47 = vld [vmem:[%s3653_s24 + $0x10] sm:$0xff]  ;;  %v2814_v48 = vld [vmem:[%s3420_s8 + $0x2e8] sm:$0xf]  ;;  %v2806_v55 = vld [vmem:[%s3420_s8 + $0x2e0] sm:$0xf] }
  0xf4   : > { %v2067_v61 = vrot.slane %v1304_v54, 4  ;;  %1834 = vmatpush.bf16.msra.mxu3 %v2531_v49  ;;  %1808 = vmatpush.bf16.msra.mxu1 %v2523_v52  ;;  %v2816_v52 = vld [vmem:[%s3420_s8 + $0x3e8] sm:$0xf0]  ;;  %v3030_v56 = vld [vmem:[%s3420_s8 + $0x3dc] sm:$0xf0]  ;;  %v408_v11 = vperm.slane %v3791_v47, 0 }
  0xf5   : > { %v2068_v62 = vrot.slane %v1317_v59, 2  ;;  %v2998_v59 = vld [vmem:[%s3420_s8 + $0x2e4] sm:$0xf]  ;;  %v2807_v1 = vor.u32 %v3030_v56, %v2806_v55  ;;  %v2566_v55 = vld [vmem:[%s3420_s8 + $0xf0] sm:$0xf] }
  0xf6   : > { %v2808_v60 = vld [vmem:[%s3420_s8 + $0x3e0] sm:$0xf0]  ;;  %v2968_v56 = vld [vmem:[%s3420_s8 + $0x1ec] sm:$0xf0] }
  0xf7   : > { %v2118_v0 = vsel %vm2110_vm2, %v2067_v61, %v2068_v62  ;;  %v409_v61 = vperm.slane %v3791_v47, 1  ;;  %v2811_v5 = vor.u32 %v2998_v59, %v2808_v60  ;;  %v2568_v59 = vld [vmem:[%s3420_s8 + $0x1f0] sm:$0xf0]  ;;  %v412_v60 = vperm.slane %v3791_v47, 4 }
  0xf8   : > { %v2119_v2 = vsel %vm2112_vm3, %v2117_v63, %v2118_v0  ;;  %v2815_v63 = vor.u32 %v3031_v50, %v2814_v48  ;;  %v2819_v0 = vor.u32 %v2999_v51, %v2816_v52  ;;  %v2969_v50 = vld [vmem:[%s3420_s8 + $0x1f4] sm:$0xf0]  ;;  %v2937_v51 = vld [vmem:[%s3420_s8 + $0xfc] sm:$0xf] }
  0xf9   : > { %2177 = vst [vmem:[%s3693_s11 + $0x10] sm:$0xff] %v2119_v2  ;;  %v1305_v6 = vpop.f32.mrf.mxu2  ;;  %v2558_v2 = vld [vmem:[%s3420_s8 + $0xe8] sm:$0xf] }
  0xfa   : > { %v1318_v9 = vpop.f32.mrf.mxu3  ;;  %v1329_v10 = vpop.f32.mrf.mxu0  ;;  %v2560_v6 = vld [vmem:[%s3420_s8 + $0x1e8] sm:$0xf0] }
  0xfb   : > { %v1342_v13 = vpop.f32.mrf.mxu1  ;;  %v1330_v40 = vadd.f32 %v1329_v10, %v404_v29  ;;  %v410_v9 = vperm.slane %v3791_v47, 2  ;;  %v2934_v10 = vld [vmem:[%s3420_s8 + $0xe4] sm:$0xf] }
  0xfc   : > { %v1343_v30 = vadd.f32 %v1342_v13, %v405_v12  ;;  %v411_v13 = vperm.slane %v3791_v47, 3  ;;  %v2555_v19 = vor.u32 %v2934_v10, %v2552_v53 }
  0xfd   : > { %2880 = vmatmul.msk.bf16.vlgmr.msrb.gmra.mxu0 %vm1160_vm0, %v3443_v26  ;;  %2881 = vmatmul.msk.bf16.vlgmr.msrb.gmra.mxu1 %vm1160_vm0, %v3443_v26 }
  0xfe   : > { %2882 = vmatmul.msk.bf16.vlgmr.msrb.gmra.mxu2 %vm1160_vm0, %v3443_v26  ;;  %1846 = vmatpush.bf16.msrb.mxu0 %v2791_v17  ;;  %v2069_v41 = vrot.slane %v1343_v30, 6  ;;  %v2551_v17 = vor.u32 %v2966_v8, %v2550_v7 }
  0xff   : > { %2883 = vmatmul.msk.bf16.vlgmr.msrb.gmra.mxu3 %vm1160_vm0, %v3443_v26  ;;  %1872 = vmatpush.bf16.msrb.mxu2 %v2799_v14  ;;  %v2559_v14 = vor.u32 %v2967_v3, %v2558_v2 }
 0x100   : > { %1885 = vmatpush.bf16.msrb.mxu3 %v2803_v15  ;;  %1859 = vmatpush.bf16.msrb.mxu1 %v2795_v21  ;;  %v2120_v45 = vsel %vm2108_vm1, %v1330_v40, %v2069_v41  ;;  %v2563_v15 = vor.u32 %v2935_v4, %v2560_v6 }
 0x101   : > { %v1355_v35 = vpop.f32.mrf.mxu2 }
 0x102   : > { %v1356_v37 = vadd.f32 %v1355_v35, %v406_v25  ;;  %v1368_v38 = vpop.f32.mrf.mxu3  ;;  %v1331_v39 = vpop.f32.mrf.mxu0  ;;  %1847 = vmatpush.bf16.msrb.mxu0 %v2535_v34  ;;  %v3033_v34 = vld [vmem:[%s3420_s8 + $0x3f4] sm:$0xf0]  ;;  %v3001_v35 = vld [vmem:[%s3420_s8 + $0x2fc] sm:$0xf] }
 0x103   : > { %v1369_v16 = vadd.f32 %v1368_v38, %v407_v31  ;;  %v1344_v42 = vpop.f32.mrf.mxu1  ;;  %1873 = vmatpush.bf16.msrb.mxu2 %v2543_v32  ;;  %v2830_v32 = vld [vmem:[%s3420_s8 + $0x2f8] sm:$0xf]  ;;  %v2822_v38 = vld [vmem:[%s3420_s8 + $0x2f0] sm:$0xf] }
 0x104   : > { %v2070_v43 = vrot.slane %v1356_v37, 4  ;;  %1886 = vmatpush.bf16.msrb.mxu3 %v2547_v33  ;;  %1860 = vmatpush.bf16.msrb.mxu1 %v2539_v36  ;;  %v2832_v36 = vld [vmem:[%s3420_s8 + $0x3f8] sm:$0xf0]  ;;  %v3032_v39 = vld [vmem:[%s3420_s8 + $0x3ec] sm:$0xf0] }
 0x105   : > { %v2071_v44 = vrot.slane %v1369_v16, 2  ;;  %v3000_v16 = vld [vmem:[%s3420_s8 + $0x2f4] sm:$0xf]  ;;  %v2823_v48 = vor.u32 %v3032_v39, %v2822_v38 }
 0x106   : > { %v2824_v42 = vld [vmem:[%s3420_s8 + $0x3f0] sm:$0xf0] }
 0x107   : > { %v2121_v46 = vsel %vm2110_vm2, %v2070_v43, %v2071_v44  ;;  %v413_v43 = vperm.slane %v3791_v47, 5  ;;  %v2827_v52 = vor.u32 %v3000_v16, %v2824_v42 }
 0x108   : > { %v2122_v49 = vsel %vm2112_vm3, %v2120_v45, %v2121_v46  ;;  %v2831_v45 = vor.u32 %v3033_v34, %v2830_v32  ;;  %v2835_v46 = vor.u32 %v3001_v35, %v2832_v36 }
 0x109   : > { %2178 = vst [vmem:[%s3693_s11 + $0x18] sm:$0xff] %v2122_v49  ;;  %v1357_v54 = vpop.f32.mrf.mxu2  ;;  %v2574_v49 = vld [vmem:[%s3420_s8 + $0xf8] sm:$0xf] }
 0x10a   : > { %v1370_v57 = vpop.f32.mrf.mxu3  ;;  %v1381_v58 = vpop.f32.mrf.mxu0  ;;  %v2576_v54 = vld [vmem:[%s3420_s8 + $0x1f8] sm:$0xf0] }
 0x10b   : > { %v1394_v62 = vpop.f32.mrf.mxu1  ;;  %v1382_v23 = vadd.f32 %v1381_v58, %v408_v11  ;;  %v414_v57 = vperm.slane %v3791_v47, 6  ;;  %v2936_v58 = vld [vmem:[%s3420_s8 + $0xf4] sm:$0xf] }
 0x10c   : > { %v1395_v12 = vadd.f32 %v1394_v62, %v409_v61  ;;  %v415_v62 = vperm.slane %v3791_v47, 7  ;;  %v2571_v3 = vor.u32 %v2936_v58, %v2568_v59 }
 0x10d   : > { %2884 = vmatmul.msk.bf16.vlgmr.msra.gmra.mxu0 %vm1160_vm0, %v3443_v26  ;;  %2885 = vmatmul.msk.bf16.vlgmr.msra.gmra.mxu1 %vm1160_vm0, %v3443_v26 }
 0x10e   : > { %2886 = vmatmul.msk.bf16.vlgmr.msra.gmra.mxu2 %vm1160_vm0, %v3443_v26  ;;  %1898 = vmatpush.bf16.msra.mxu0 %v2807_v1  ;;  %v2072_v24 = vrot.slane %v1395_v12, 6  ;;  %v2567_v1 = vor.u32 %v2968_v56, %v2566_v55 }
 0x10f   : > { %2887 = vmatmul.msk.bf16.vlgmr.msra.gmra.mxu3 %vm1160_vm0, %v3443_v26  ;;  %1924 = vmatpush.bf16.msra.mxu2 %v2815_v63  ;;  %v2575_v63 = vor.u32 %v2969_v50, %v2574_v49 }
 0x110   : > { %1937 = vmatpush.bf16.msra.mxu3 %v2819_v0  ;;  %1911 = vmatpush.bf16.msra.mxu1 %v2811_v5  ;;  %v2123_v30 = vsel %vm2108_vm1, %v1382_v23, %v2072_v24  ;;  %v2579_v0 = vor.u32 %v2937_v51, %v2576_v54 }
 0x111   : > { %v1407_v18 = vpop.f32.mrf.mxu2 }
 0x112   : > { %v1408_v20 = vadd.f32 %v1407_v18, %v410_v9  ;;  %v1420_v21 = vpop.f32.mrf.mxu3  ;;  %v1383_v22 = vpop.f32.mrf.mxu0  ;;  %1899 = vmatpush.bf16.msra.mxu0 %v2551_v17 }
 0x113   : > { %v1421_v25 = vadd.f32 %v1420_v21, %v411_v13  ;;  %v1396_v27 = vpop.f32.mrf.mxu1  ;;  %1925 = vmatpush.bf16.msra.mxu2 %v2559_v14  ;;  %v379_v14 = vld [vmem:[%s3653_s24 + $0x18] sm:$0xff] }
 0x114   : > { %v2073_v28 = vrot.slane %v1408_v20, 4  ;;  %1938 = vmatpush.bf16.msra.mxu3 %v2563_v15  ;;  %1912 = vmatpush.bf16.msra.mxu1 %v2555_v19  ;;  %v417_v19 = vperm.slane %v379_v14, 1  ;;  %v418_v21 = vperm.slane %v379_v14, 2  ;;  %v416_v22 = vperm.slane %v379_v14, 0 }
 0x115   : > { %v2074_v29 = vrot.slane %v1421_v25, 2  ;;  %v419_v24 = vperm.slane %v379_v14, 3  ;;  %v421_v16 = vperm.slane %v379_v14, 5 }
 0x117   : > { %v2124_v31 = vsel %vm2110_vm2, %v2073_v28, %v2074_v29 }
 0x118   : > { %v2125_v33 = vsel %vm2112_vm3, %v2123_v30, %v2124_v31 }
 0x119   : > { %2179 = vst [vmem:[%s3693_s11 + $0x20] sm:$0xff] %v2125_v33  ;;  %v1409_v37 = vpop.f32.mrf.mxu2 }
 0x11a   : > { %v1422_v40 = vpop.f32.mrf.mxu3  ;;  %v1433_v41 = vpop.f32.mrf.mxu0 }
 0x11b   : > { %v1446_v44 = vpop.f32.mrf.mxu1  ;;  %v1434_v7 = vadd.f32 %v1433_v41, %v412_v60 }
 0x11c   : > { %v1447_v61 = vadd.f32 %v1446_v44, %v413_v43  ;;  %v422_v43 = vperm.slane %v379_v14, 6  ;;  %v420_v44 = vperm.slane %v379_v14, 4 }
 0x11d   : > { %2888 = vmatmul.msk.bf16.vlgmr.msrb.gmra.mxu0 %vm1160_vm0, %v3443_v26  ;;  %2889 = vmatmul.msk.bf16.vlgmr.msrb.gmra.mxu1 %vm1160_vm0, %v3443_v26 }
 0x11e   : > { %2890 = vmatmul.msk.bf16.vlgmr.msrb.gmra.mxu2 %vm1160_vm0, %v3443_v26  ;;  %1950 = vmatpush.bf16.msrb.mxu0 %v2823_v48  ;;  %v2075_v8 = vrot.slane %v1447_v61, 6 }
 0x11f   : > { %2891 = vmatmul.msk.bf16.vlgmr.msrb.gmra.mxu3 %vm1160_vm0, %v3443_v26  ;;  %1976 = vmatpush.bf16.msrb.mxu2 %v2831_v45 }
 0x120   : > { %1989 = vmatpush.bf16.msrb.mxu3 %v2835_v46  ;;  %1963 = vmatpush.bf16.msrb.mxu1 %v2827_v52  ;;  %v2126_v11 = vsel %vm2108_vm1, %v1434_v7, %v2075_v8  ;;  %v423_v46 = vperm.slane %v379_v14, 7 }
 0x121   : > { %v1459_v2 = vpop.f32.mrf.mxu2 }
 0x122   : > { %v1460_v4 = vadd.f32 %v1459_v2, %v414_v57  ;;  %v1472_v5 = vpop.f32.mrf.mxu3  ;;  %v1435_v6 = vpop.f32.mrf.mxu0  ;;  %1951 = vmatpush.bf16.msrb.mxu0 %v2567_v1 }
 0x123   : > { %v1473_v9 = vadd.f32 %v1472_v5, %v415_v62  ;;  %v1448_v10 = vpop.f32.mrf.mxu1  ;;  %1977 = vmatpush.bf16.msrb.mxu2 %v2575_v63  ;;  %v380_v62 = vld [vmem:[%s3653_s24 + $0x20] sm:$0xff] }
 0x124   : > { %v2076_v47 = vrot.slane %v1460_v4, 4  ;;  %1990 = vmatpush.bf16.msrb.mxu3 %v2579_v0  ;;  %1964 = vmatpush.bf16.msrb.mxu1 %v2571_v3  ;;  %v425_v1 = vperm.slane %v380_v62, 1  ;;  %v426_v3 = vperm.slane %v380_v62, 2  ;;  %v424_v4 = vperm.slane %v380_v62, 0 }
 0x125   : > { %v2077_v53 = vrot.slane %v1473_v9, 2  ;;  %v427_v6 = vperm.slane %v380_v62, 3 }
 0x127   : > { %v2127_v12 = vsel %vm2110_vm2, %v2076_v47, %v2077_v53 }
 0x128   : > { %v2128_v13 = vsel %vm2112_vm3, %v2126_v11, %v2127_v12 }
 0x129   : > { %2180 = vst [vmem:[%s3693_s11 + $0x28] sm:$0xff] %v2128_v13  ;;  %v1461_v15 = vpop.f32.mrf.mxu2 }
 0x12a   : > { %v1474_v17 = vpop.f32.mrf.mxu3  ;;  %v1485_v18 = vpop.f32.mrf.mxu0 }
 0x12b   : > { %v1498_v20 = vpop.f32.mrf.mxu1  ;;  %v1486_v30 = vadd.f32 %v1485_v18, %v416_v22  ;;  %v429_v22 = vperm.slane %v380_v62, 5 }
 0x12c   : > { %v1499_v23 = vadd.f32 %v1498_v20, %v417_v19 }
 0x12d   : > { %2892 = vmatmul.msk.bf16.vlgmr.msra.gmra.mxu0 %vm1160_vm0, %v3443_v26  ;;  %2893 = vmatmul.msk.bf16.vlgmr.msra.gmra.mxu1 %vm1160_vm0, %v3443_v26 }
 0x12e   : > { %2894 = vmatmul.msk.bf16.vlgmr.msra.gmra.mxu2 %vm1160_vm0, %v3443_v26  ;;  %v2078_v31 = vrot.slane %v1499_v23, 6 }
 0x12f   : > { %2895 = vmatmul.msk.bf16.vlgmr.msra.gmra.mxu3 %vm1160_vm0, %v3443_v26 }
 0x130   : > { %v2129_v36 = vsel %vm2108_vm1, %v1486_v30, %v2078_v31 }
 0x131   : > { %v1511_v25 = vpop.f32.mrf.mxu2 }
 0x132   : > { %v1512_v27 = vadd.f32 %v1511_v25, %v418_v21  ;;  %v1524_v28 = vpop.f32.mrf.mxu3  ;;  %v1487_v29 = vpop.f32.mrf.mxu0  ;;  %v428_v25 = vperm.slane %v380_v62, 4 }
 0x133   : > { %v1525_v32 = vadd.f32 %v1524_v28, %v419_v24  ;;  %v1500_v33 = vpop.f32.mrf.mxu1  ;;  %v430_v24 = vperm.slane %v380_v62, 6  ;;  %v431_v28 = vperm.slane %v380_v62, 7 }
 0x134   : > { %v2079_v34 = vrot.slane %v1512_v27, 4 }
 0x135   : > { %v2080_v35 = vrot.slane %v1525_v32, 2 }
 0x137   : > { %v2130_v37 = vsel %vm2110_vm2, %v2079_v34, %v2080_v35 }
 0x138   : > { %v2131_v38 = vsel %vm2112_vm3, %v2129_v36, %v2130_v37 }
 0x139   : > { %2181 = vst [vmem:[%s3693_s11 + $0x30] sm:$0xff] %v2131_v38  ;;  %v1513_v39 = vpop.f32.mrf.mxu2 }
 0x13a   : > { %v1526_v40 = vpop.f32.mrf.mxu3  ;;  %v1537_v41 = vpop.f32.mrf.mxu0 }
 0x13b   : > { %v1550_v42 = vpop.f32.mrf.mxu1  ;;  %v1538_v52 = vadd.f32 %v1537_v41, %v420_v44 }
 0x13c   : > { %v1551_v45 = vadd.f32 %v1550_v42, %v421_v16  ;;  %v381_v16 = vld [vmem:[%s3653_s24 + $0x28] sm:$0xff] }
 0x13d   : > { %2896 = vmatmul.msk.bf16.vlgmr.msrb.gmra.mxu0 %vm1160_vm0, %v3443_v26  ;;  %2897 = vmatmul.msk.bf16.vlgmr.msrb.gmra.mxu1 %vm1160_vm0, %v3443_v26 }
 0x13e   : > { %2898 = vmatmul.msk.bf16.vlgmr.msrb.gmra.mxu2 %vm1160_vm0, %v3443_v26  ;;  %v2081_v54 = vrot.slane %v1551_v45, 6  ;;  %v433_v45 = vperm.slane %v381_v16, 1 }
 0x13f   : > { %2899 = vmatmul.msk.bf16.vlgmr.msrb.gmra.mxu3 %vm1160_vm0, %v3443_v26 }
 0x140   : > { %v2132_v59 = vsel %vm2108_vm1, %v1538_v52, %v2081_v54 }
 0x141   : > { %v1563_v48 = vpop.f32.mrf.mxu2 }
 0x142   : > { %v1564_v49 = vadd.f32 %v1563_v48, %v422_v43  ;;  %v1576_v50 = vpop.f32.mrf.mxu3  ;;  %v1539_v51 = vpop.f32.mrf.mxu0  ;;  %v434_v48 = vperm.slane %v381_v16, 2 }
 0x143   : > { %v1577_v55 = vadd.f32 %v1576_v50, %v423_v46  ;;  %v1552_v56 = vpop.f32.mrf.mxu1  ;;  %v435_v51 = vperm.slane %v381_v16, 3 }
 0x144   : > { %v2082_v57 = vrot.slane %v1564_v49, 4  ;;  %v432_v49 = vperm.slane %v381_v16, 0 }
 0x145   : > { %v2083_v58 = vrot.slane %v1577_v55, 2 }
 0x147   : > { %v2133_v60 = vsel %vm2110_vm2, %v2082_v57, %v2083_v58 }
 0x148   : > { %v2134_v61 = vsel %vm2112_vm3, %v2132_v59, %v2133_v60 }
 0x149   : > { %2182 = vst [vmem:[%s3693_s11 + $0x38] sm:$0xff] %v2134_v61  ;;  %v1565_v26 = vpop.f32.mrf.mxu2 }
 0x14a   : > { %v1578_v63 = vpop.f32.mrf.mxu3  ;;  %v1589_v0 = vpop.f32.mrf.mxu0 }
 0x14b   : > { %v1602_v2 = vpop.f32.mrf.mxu1  ;;  %v1590_v47 = vadd.f32 %v1589_v0, %v424_v4  ;;  %v437_v4 = vperm.slane %v381_v16, 5 }
 0x14c   : > { %v1603_v5 = vadd.f32 %v1602_v2, %v425_v1 }
 0x14e   : > { %v2084_v53 = vrot.slane %v1603_v5, 6 }
 0x150   : > { %v2135_v15 = vsel %vm2108_vm1, %v1590_v47, %v2084_v53 }
 0x151   : > { %v1615_v7 = vpop.f32.mrf.mxu2 }
 0x152   : > { %v1616_v8 = vadd.f32 %v1615_v7, %v426_v3  ;;  %v1628_v9 = vpop.f32.mrf.mxu3  ;;  %v1591_v10 = vpop.f32.mrf.mxu0  ;;  %v436_v7 = vperm.slane %v381_v16, 4 }
 0x153   : > { %v1629_v11 = vadd.f32 %v1628_v9, %v427_v6  ;;  %v1604_v12 = vpop.f32.mrf.mxu1  ;;  %v438_v6 = vperm.slane %v381_v16, 6  ;;  %v439_v9 = vperm.slane %v381_v16, 7 }
 0x154   : > { %v2085_v13 = vrot.slane %v1616_v8, 4 }
 0x155   : > { %v2086_v14 = vrot.slane %v1629_v11, 2 }
 0x157   : > { %v2136_v17 = vsel %vm2110_vm2, %v2085_v13, %v2086_v14 }
 0x158   : > { %v2137_v18 = vsel %vm2112_vm3, %v2135_v15, %v2136_v17 }
 0x159   : > { %2183 = vst [vmem:[%s3693_s11 + $0x40] sm:$0xff] %v2137_v18  ;;  %v1617_v19 = vpop.f32.mrf.mxu2 }
 0x15a   : > { %v1630_v20 = vpop.f32.mrf.mxu3  ;;  %v1641_v21 = vpop.f32.mrf.mxu0 }
 0x15b   : > { %v1654_v23 = vpop.f32.mrf.mxu1  ;;  %v1642_v33 = vadd.f32 %v1641_v21, %v428_v25 }
 0x15c   : > { %v1655_v27 = vadd.f32 %v1654_v23, %v429_v22  ;;  %v382_v22 = vld [vmem:[%s3653_s24 + $0x30] sm:$0xff] }
 0x15e   : > { %v2087_v34 = vrot.slane %v1655_v27, 6  ;;  %v441_v27 = vperm.slane %v382_v22, 1 }
 0x160   : > { %v2138_v39 = vsel %vm2108_vm1, %v1642_v33, %v2087_v34 }
 0x161   : > { %v1667_v29 = vpop.f32.mrf.mxu2 }
 0x162   : > { %v1668_v30 = vadd.f32 %v1667_v29, %v430_v24  ;;  %v1680_v31 = vpop.f32.mrf.mxu3  ;;  %v1643_v32 = vpop.f32.mrf.mxu0  ;;  %v442_v29 = vperm.slane %v382_v22, 2 }
 0x163   : > { %v1681_v35 = vadd.f32 %v1680_v31, %v431_v28  ;;  %v1656_v36 = vpop.f32.mrf.mxu1  ;;  %v443_v32 = vperm.slane %v382_v22, 3 }
 0x164   : > { %v2088_v37 = vrot.slane %v1668_v30, 4  ;;  %v440_v30 = vperm.slane %v382_v22, 0 }
 0x165   : > { %v2089_v38 = vrot.slane %v1681_v35, 2 }
 0x167   : > { %v2139_v40 = vsel %vm2110_vm2, %v2088_v37, %v2089_v38 }
 0x168   : > { %v2140_v41 = vsel %vm2112_vm3, %v2138_v39, %v2139_v40 }
 0x169   : > { %2184 = vst [vmem:[%s3693_s11 + $0x48] sm:$0xff] %v2140_v41  ;;  %v1669_v42 = vpop.f32.mrf.mxu2 }
 0x16a   : > { %v1682_v43 = vpop.f32.mrf.mxu3  ;;  %v1693_v44 = vpop.f32.mrf.mxu0 }
 0x16b   : > { %v1706_v46 = vpop.f32.mrf.mxu1  ;;  %v1694_v57 = vadd.f32 %v1693_v44, %v432_v49  ;;  %v445_v49 = vperm.slane %v382_v22, 5 }
 0x16c   : > { %v1707_v50 = vadd.f32 %v1706_v46, %v433_v45 }
 0x16e   : > { %v2090_v58 = vrot.slane %v1707_v50, 6 }
 0x170   : > { %v2141_v26 = vsel %vm2108_vm1, %v1694_v57, %v2090_v58 }
 0x171   : > { %v1719_v52 = vpop.f32.mrf.mxu2 }
 0x172   : > { %v1720_v54 = vadd.f32 %v1719_v52, %v434_v48  ;;  %v1732_v55 = vpop.f32.mrf.mxu3  ;;  %v1695_v56 = vpop.f32.mrf.mxu0  ;;  %v444_v52 = vperm.slane %v382_v22, 4 }
 0x173   : > { %v1733_v59 = vadd.f32 %v1732_v55, %v435_v51  ;;  %v1708_v60 = vpop.f32.mrf.mxu1  ;;  %v446_v51 = vperm.slane %v382_v22, 6  ;;  %v447_v55 = vperm.slane %v382_v22, 7 }
 0x174   : > { %v2091_v61 = vrot.slane %v1720_v54, 4 }
 0x175   : > { %v2092_v62 = vrot.slane %v1733_v59, 2 }
 0x177   : > { %v2142_v63 = vsel %vm2110_vm2, %v2091_v61, %v2092_v62 }
 0x178   : > { %v2143_v0 = vsel %vm2112_vm3, %v2141_v26, %v2142_v63 }
 0x179   : > { %2185 = vst [vmem:[%s3693_s11 + $0x50] sm:$0xff] %v2143_v0  ;;  %v1721_v1 = vpop.f32.mrf.mxu2 }
 0x17a   : > { %v1734_v2 = vpop.f32.mrf.mxu3  ;;  %v1745_v3 = vpop.f32.mrf.mxu0 }
 0x17b   : > { %v1758_v5 = vpop.f32.mrf.mxu1  ;;  %v1746_v12 = vadd.f32 %v1745_v3, %v436_v7 }
 0x17c   : > { %v1759_v8 = vadd.f32 %v1758_v5, %v437_v4  ;;  %v383_v4 = vld [vmem:[%s3653_s24 + $0x38] sm:$0xff] }
 0x17e   : > { %v2093_v13 = vrot.slane %v1759_v8, 6  ;;  %v449_v8 = vperm.slane %v383_v4, 1 }
 0x180   : > { %v2144_v19 = vsel %vm2108_vm1, %v1746_v12, %v2093_v13 }
 0x181   : > { %v1771_v10 = vpop.f32.mrf.mxu2 }
 0x182   : > { %v1772_v47 = vadd.f32 %v1771_v10, %v438_v6  ;;  %v1784_v53 = vpop.f32.mrf.mxu3  ;;  %v1747_v11 = vpop.f32.mrf.mxu0  ;;  %v450_v10 = vperm.slane %v383_v4, 2 }
 0x183   : > { %v1785_v14 = vadd.f32 %v1784_v53, %v439_v9  ;;  %v1760_v15 = vpop.f32.mrf.mxu1  ;;  %v451_v11 = vperm.slane %v383_v4, 3 }
 0x184   : > { %v2094_v17 = vrot.slane %v1772_v47, 4  ;;  %v448_v47 = vperm.slane %v383_v4, 0 }
 0x185   : > { %v2095_v18 = vrot.slane %v1785_v14, 2 }
 0x187   : > { %v2145_v20 = vsel %vm2110_vm2, %v2094_v17, %v2095_v18 }
 0x188   : > { %v2146_v21 = vsel %vm2112_vm3, %v2144_v19, %v2145_v20 }
 0x189   : > { %2186 = vst [vmem:[%s3693_s11 + $0x58] sm:$0xff] %v2146_v21  ;;  %v1773_v23 = vpop.f32.mrf.mxu2 }
 0x18a   : > { %v1786_v24 = vpop.f32.mrf.mxu3  ;;  %v1797_v25 = vpop.f32.mrf.mxu0 }
 0x18b   : > { %v1810_v28 = vpop.f32.mrf.mxu1  ;;  %v1798_v37 = vadd.f32 %v1797_v25, %v440_v30  ;;  %v453_v30 = vperm.slane %v383_v4, 5 }
 0x18c   : > { %v1811_v31 = vadd.f32 %v1810_v28, %v441_v27 }
 0x18e   : > { %v2096_v38 = vrot.slane %v1811_v31, 6 }
 0x190   : > { %v2147_v42 = vsel %vm2108_vm1, %v1798_v37, %v2096_v38 }
 0x191   : > { %v1823_v33 = vpop.f32.mrf.mxu2 }
 0x192   : > { %v1824_v34 = vadd.f32 %v1823_v33, %v442_v29  ;;  %v1836_v35 = vpop.f32.mrf.mxu3  ;;  %v1799_v36 = vpop.f32.mrf.mxu0  ;;  %v452_v33 = vperm.slane %v383_v4, 4 }
 0x193   : > { %v1837_v39 = vadd.f32 %v1836_v35, %v443_v32  ;;  %v1812_v40 = vpop.f32.mrf.mxu1  ;;  %v454_v32 = vperm.slane %v383_v4, 6  ;;  %v455_v35 = vperm.slane %v383_v4, 7 }
 0x194   : > { %v2097_v41 = vrot.slane %v1824_v34, 4 }
 0x195   : > { %v2098_v16 = vrot.slane %v1837_v39, 2 }
 0x197   : > { %v2148_v43 = vsel %vm2110_vm2, %v2097_v41, %v2098_v16 }
 0x198   : > { %v2149_v44 = vsel %vm2112_vm3, %v2147_v42, %v2148_v43 }
 0x199   : > { %2187 = vst [vmem:[%s3693_s11 + $0x60] sm:$0xff] %v2149_v44  ;;  %v1825_v45 = vpop.f32.mrf.mxu2 }
 0x19a   : > { %v1838_v46 = vpop.f32.mrf.mxu3  ;;  %v1849_v48 = vpop.f32.mrf.mxu0 }
 0x19b   : > { %v1862_v50 = vpop.f32.mrf.mxu1  ;;  %v1850_v60 = vadd.f32 %v1849_v48, %v444_v52 }
 0x19c   : > { %v1863_v54 = vadd.f32 %v1862_v50, %v445_v49 }
 0x19e   : > { %v2099_v61 = vrot.slane %v1863_v54, 6 }
 0x1a0   : > { %v2150_v1 = vsel %vm2108_vm1, %v1850_v60, %v2099_v61 }
 0x1a1   : > { %v1875_v56 = vpop.f32.mrf.mxu2 }
 0x1a2   : > { %v1876_v57 = vadd.f32 %v1875_v56, %v446_v51  ;;  %v1888_v58 = vpop.f32.mrf.mxu3  ;;  %v1851_v59 = vpop.f32.mrf.mxu0 }
 0x1a3   : > { %v1889_v62 = vadd.f32 %v1888_v58, %v447_v55  ;;  %v1864_v26 = vpop.f32.mrf.mxu1 }
 0x1a4   : > { %v2100_v63 = vrot.slane %v1876_v57, 4 }
 0x1a5   : > { %v2101_v0 = vrot.slane %v1889_v62, 2 }
 0x1a7   : > { %v2151_v2 = vsel %vm2110_vm2, %v2100_v63, %v2101_v0 }
 0x1a8   : > { %v2152_v3 = vsel %vm2112_vm3, %v2150_v1, %v2151_v2 }
 0x1a9   : > { %2188 = vst [vmem:[%s3693_s11 + $0x68] sm:$0xff] %v2152_v3  ;;  %v1877_v5 = vpop.f32.mrf.mxu2 }
 0x1aa   : > { %v1890_v6 = vpop.f32.mrf.mxu3  ;;  %v1901_v7 = vpop.f32.mrf.mxu0 }
 0x1ab   : > { %v1914_v9 = vpop.f32.mrf.mxu1  ;;  %v1902_v17 = vadd.f32 %v1901_v7, %v448_v47 }
 0x1ac   : > { %v1915_v53 = vadd.f32 %v1914_v9, %v449_v8 }
 0x1ae   : > { %v2102_v18 = vrot.slane %v1915_v53, 6 }
 0x1b0   : > { %v2153_v23 = vsel %vm2108_vm1, %v1902_v17, %v2102_v18 }
 0x1b1   : > { %v1927_v12 = vpop.f32.mrf.mxu2 }
 0x1b2   : > { %v1928_v13 = vadd.f32 %v1927_v12, %v450_v10  ;;  %v1940_v14 = vpop.f32.mrf.mxu3  ;;  %v1903_v15 = vpop.f32.mrf.mxu0 }
 0x1b3   : > { %v1941_v19 = vadd.f32 %v1940_v14, %v451_v11  ;;  %v1916_v20 = vpop.f32.mrf.mxu1 }
 0x1b4   : > { %v2103_v21 = vrot.slane %v1928_v13, 4 }
 0x1b5   : > { %v2104_v22 = vrot.slane %v1941_v19, 2 }
 0x1b7   : > { %v2154_v24 = vsel %vm2110_vm2, %v2103_v21, %v2104_v22 }
 0x1b8   : > { %v2155_v25 = vsel %vm2112_vm3, %v2153_v23, %v2154_v24 }
 0x1b9   : > { %2189 = vst [vmem:[%s3693_s11 + $0x70] sm:$0xff] %v2155_v25  ;;  %v1929_v27 = vpop.f32.mrf.mxu2 }
 0x1ba   : > { %v1942_v28 = vpop.f32.mrf.mxu3  ;;  %v1953_v29 = vpop.f32.mrf.mxu0 }
 0x1bb   : > { %v1966_v31 = vpop.f32.mrf.mxu1  ;;  %v1954_v40 = vadd.f32 %v1953_v29, %v452_v33 }
 0x1bc   : > { %v1967_v34 = vadd.f32 %v1966_v31, %v453_v30 }
 0x1be   : > { %v2105_v41 = vrot.slane %v1967_v34, 6 }
 0x1c0   : > { %v2156_v45 = vsel %vm2108_vm1, %v1954_v40, %v2105_v41 }
 0x1c1   : > { %v1979_v36 = vpop.f32.mrf.mxu2 }
 0x1c2   : > { %v1980_v37 = vadd.f32 %v1979_v36, %v454_v32  ;;  %v1992_v38 = vpop.f32.mrf.mxu3  ;;  %v1955_v39 = vpop.f32.mrf.mxu0 }
 0x1c3   : > { %v1993_v16 = vadd.f32 %v1992_v38, %v455_v35  ;;  %v1968_v42 = vpop.f32.mrf.mxu1 }
 0x1c4   : > { %v2106_v43 = vrot.slane %v1980_v37, 4 }
 0x1c5   : > { %v2107_v44 = vrot.slane %v1993_v16, 2 }
 0x1c7   : > { %v2157_v46 = vsel %vm2110_vm2, %v2106_v43, %v2107_v44 }
 0x1c8   : > { %v2158_v48 = vsel %vm2112_vm3, %v2156_v45, %v2157_v46 }
 0x1c9   : > { %2190 = vst [vmem:[%s3693_s11 + $0x78] sm:$0xff] %v2158_v48  ;;  %v1981_v49 = vpop.f32.mrf.mxu2 }
 0x1ca   : > { %v1994_v50 = vpop.f32.mrf.mxu3 }
 0x1cb   : > { %3217 = shalt.err (!%p3214_p5)
}
 0x1cc   : > { %3043 = dma.vmem_to_hbm [thread:$0]  (%p3371_p11), %s2206_s21, 2048, %s2208_s22, %s2192_s27  }
 0x1cd PF: > { %s2219_s29 = sand.u32 1, %s3248_s12   ;;  %p3965_p7 = scmp.ge.s32.totalorder %s3260_s15, 2 }
 0x1ce   : > { %s2220_s8 = scalar_lea.sflag [#allocation4], %s2219_s29 }
 0x1cf   : > { %p3057_p9 = pnand %p3965_p7, %p3375_p12 }
 0x1d1   : > { %p3058_p13 = pneg %p3057_p9 }
 0x1d3   : > { %3243 = dma.done.wait (%p3058_p13), %s2220_s8, 2048  }
 0x1d4   : > { %3245 = vsyncadd (%p3058_p13), %s2220_s8, 4294965248  ;;  %p17_p0 = scmp.ge.s32.totalorder %s3307_s16, 4   ;;  %s3966_s12 = smov %s3252_s13 }
 0x1d5   : > { %s3967_s13 = smov %s3256_s14  ;;  %s3968_s14 = smov %s3318_s19 }
 0x1d6   : > { %s3969_s15 = smov %s3307_s16  ;;  %19 = sbr.rel (!%p17_p0) target bundleno = 8 (0x8), region = 93 }
 0x1db   :  { %2226 = vsyncpa [#allocation3], 1 }
 0x1dc   :  { %2228 = vsyncpa [#allocation3 + $0x1], 1 }
 0x1dd   :  { %2229 = vsyncpa [#allocation6], 1 }
 0x1de   :  { %2231 = vsyncpa [#allocation6 + $0x1], 1 }
 0x1df   :  { %2232 = vsyncpa [#allocation4], 1 }
 0x1e0   :  { %2234 = vsyncpa [#allocation4 + $0x1], 1 }

</bundles_post_ra>
